<compile_context>
chip_gen: v5e
topology: v5e:2x2
jax: 0.10.0
libtpu: 0.0.40
codegen_flags: <defaults>
</compile_context>

<pallas_src>
import jax
import jax.numpy as jnp
from jax.experimental import pallas as pl
from jax.experimental.pallas import tpu as pltpu

# ---------------- configuration (small synthetic shapes) ----------------
B = 2          # batch
T = 16         # motion frames
DM = 8         # motion feature dim
HM = 32        # motion encoder hidden
S = 8          # text sequence length
H = 32         # text hidden size
NH = 4         # attention heads
DH = H // NH   # head dim
MLP = 4 * H    # CLIP MLP intermediate (=128, lane-dense)
VOCAB = 64     # vocab size
NLAYERS = 2    # transformer layers
E = 32         # shared embedding dim
TEMP = 0.07


def _ln(x, g, b, eps=1e-5):
    """Row LayerNorm (f32 statistics). g/b are [1, H] and broadcast."""
    mu = jnp.mean(x, axis=-1, keepdims=True)
    var = jnp.mean(jnp.square(x - mu), axis=-1, keepdims=True)
    return (x - mu) * jax.lax.rsqrt(var + eps) * g + b


# ------------------- fused motion encoder kernel -------------------
def _motion_kernel(x_ref, w1_ref, b1_ref, w2_ref, b2_ref, len_ref, o_ref):
    x = x_ref[...]                                                  # [B*T, DM]
    h = jnp.dot(x, w1_ref[...], preferred_element_type=jnp.float32) + b1_ref[...]
    h = jax.nn.gelu(h)
    h = jnp.dot(h, w2_ref[...], preferred_element_type=jnp.float32) + b2_ref[...]  # [B*T, E]

    # length-masked mean pool via a [B, B*T] averaging matrix (single matmul)
    lens = len_ref[...]                                             # [B, 1] int32
    row = jax.lax.broadcasted_iota(jnp.int32, (B, B * T), 0)
    col = jax.lax.broadcasted_iota(jnp.int32, (B, B * T), 1)
    t = col - row * T                                               # frame index within row's batch
    valid = jnp.logical_and(jnp.logical_and(t >= 0, t < T), t < lens)
    denom = jnp.maximum(jnp.minimum(lens, T), 1).astype(jnp.float32)  # [B, 1]
    w = valid.astype(jnp.float32) / denom                           # [B, B*T]
    o_ref[...] = jnp.dot(w, h, preferred_element_type=jnp.float32)  # [B, E]


def motion_encoder_forward(p, motion, lengths):
    Bm, Tm, Dm = motion.shape
    x = motion.reshape(Bm * Tm, Dm)
    lens2 = lengths.astype(jnp.int32).reshape(Bm, 1)
    return pl.pallas_call(
        _motion_kernel,
        grid=(1,),
        in_specs=[
            pl.BlockSpec((Bm * Tm, Dm), lambda i: (0, 0)),
            pl.BlockSpec((DM, HM), lambda i: (0, 0)),
            pl.BlockSpec((1, HM), lambda i: (0, 0)),
            pl.BlockSpec((HM, E), lambda i: (0, 0)),
            pl.BlockSpec((1, E), lambda i: (0, 0)),
            pl.BlockSpec((Bm, 1), lambda i: (0, 0)),
        ],
        out_specs=pl.BlockSpec((Bm, E), lambda i: (0, 0)),
        out_shape=jax.ShapeDtypeStruct((Bm, E), jnp.float32),
    )(x, p["w1"], p["b1"].reshape(1, HM), p["w2"], p["b2"].reshape(1, E), lens2)


# ------------------- fused CLIP text tower kernel -------------------
def _text_tower_kernel(x0_ref, mask_ref,
                       ln1g_ref, ln1b_ref, wqkv_ref, bqkv_ref, wo_ref, bo_ref,
                       ln2g_ref, ln2b_ref, wfc1_ref, bfc1_ref, wfc2_ref, bfc2_ref,
                       lnfg_ref, lnfb_ref, wproj_ref,
                       out_ref, x_scr):
    l = pl.program_id(1)

    @pl.when(l == 0)
    def _():
        x_scr[...] = x0_ref[...]                    # load residual stream for this batch row

    x = x_scr[...]                                  # [S, H]
    maskv = mask_ref[...]                           # [1, S] key-padding mask (float)

    # ---- attention sub-block (pre-LN) ----
    xl = _ln(x, ln1g_ref[...], ln1b_ref[...])
    qkv = jnp.dot(xl, wqkv_ref[...], preferred_element_type=jnp.float32) + bqkv_ref[...]  # [S, 3H]
    q = qkv[:, 0:H]
    k = qkv[:, H:2 * H]
    v = qkv[:, 2 * H:3 * H]

    q_idx = jax.lax.broadcasted_iota(jnp.int32, (S, S), 0)
    k_idx = jax.lax.broadcasted_iota(jnp.int32, (S, S), 1)
    allow = jnp.logical_and(k_idx <= q_idx, maskv > 0.5)            # causal AND key not padded
    bias = jnp.where(allow, 0.0, -1e9).astype(jnp.float32)          # [S, S]

    scale = DH ** -0.5
    wo = wo_ref[...]                                                # [H, H]
    attn_proj = jnp.zeros((S, H), jnp.float32)
    for hh in range(NH):                                            # static unroll over heads
        qh = q[:, hh * DH:(hh + 1) * DH]
        kh = k[:, hh * DH:(hh + 1) * DH]
        vh = v[:, hh * DH:(hh + 1) * DH]
        s = jax.lax.dot_general(qh, kh, (((1,), (1,)), ((), ())),
                                preferred_element_type=jnp.float32)
        s = s * scale + bias
        s = s - jnp.max(s, axis=-1, keepdims=True)
        ps = jnp.exp(s)
        ps = ps * pl.reciprocal(jnp.sum(ps, axis=-1, keepdims=True), approx=True)
        oh = jnp.dot(ps, vh, preferred_element_type=jnp.float32)    # [S, DH]
        # fold head output directly into the output projection: concat(oh) @ wo
        attn_proj = attn_proj + jnp.dot(oh, wo[hh * DH:(hh + 1) * DH, :],
                                        preferred_element_type=jnp.float32)
    x = x + attn_proj + bo_ref[...]

    # ---- MLP sub-block (quick-GELU) ----
    xl2 = _ln(x, ln2g_ref[...], ln2b_ref[...])
    h1 = jnp.dot(xl2, wfc1_ref[...], preferred_element_type=jnp.float32) + bfc1_ref[...]
    h1 = h1 * jax.nn.sigmoid(1.702 * h1)
    x = x + jnp.dot(h1, wfc2_ref[...], preferred_element_type=jnp.float32) + bfc2_ref[...]
    x_scr[...] = x

    # ---- final LN + EOS pooling + text projection (last layer only) ----
    @pl.when(l == NLAYERS - 1)
    def _():
        xf = _ln(x, lnfg_ref[...], lnfb_ref[...])                   # [S, H]
        lens = jnp.sum(maskv, axis=-1, keepdims=True)               # [1, 1]
        s_idx = jax.lax.broadcasted_iota(jnp.int32, (1, S), 1).astype(jnp.float32)
        onehot = (jnp.abs(s_idx - (lens - 1.0)) < 0.5).astype(jnp.float32)   # [1, S]
        pooled = jnp.dot(onehot, xf, preferred_element_type=jnp.float32)     # [1, H]
        out_ref[...] = jnp.dot(pooled, wproj_ref[...],
                               preferred_element_type=jnp.float32)           # [1, E] (no bias)


def clip_text_forward(p, input_ids, attention_mask):
    Bt, St = input_ids.shape
    # token embedding gather stays an XLA gather (vocab table kept out of VMEM)
    tok = jnp.take(p["token_emb"], input_ids, axis=0)               # [B, S, H]
    x0 = tok + p["pos_emb"][:St][None]                              # [B, S, H]
    mask = attention_mask.astype(jnp.float32).reshape(Bt, 1, St)

    stk = p["stacked"]
    out = pl.pallas_call(
        _text_tower_kernel,
        grid=(Bt, NLAYERS),
        in_specs=[
            pl.BlockSpec((None, St, H), lambda b, l: (b, 0, 0)),        # x0 (per batch row)
            pl.BlockSpec((None, 1, St), lambda b, l: (b, 0, 0)),        # mask
            pl.BlockSpec((None, 1, H), lambda b, l: (l, 0, 0)),         # ln1_g
            pl.BlockSpec((None, 1, H), lambda b, l: (l, 0, 0)),         # ln1_b
            pl.BlockSpec((None, H, 3 * H), lambda b, l: (l, 0, 0)),     # w_qkv (fused)
            pl.BlockSpec((None, 1, 3 * H), lambda b, l: (l, 0, 0)),     # b_qkv
            pl.BlockSpec((None, H, H), lambda b, l: (l, 0, 0)),         # wo
            pl.BlockSpec((None, 1, H), lambda b, l: (l, 0, 0)),         # bo
            pl.BlockSpec((None, 1, H), lambda b, l: (l, 0, 0)),         # ln2_g
            pl.BlockSpec((None, 1, H), lambda b, l: (l, 0, 0)),         # ln2_b
            pl.BlockSpec((None, H, MLP), lambda b, l: (l, 0, 0)),       # w_fc1
            pl.BlockSpec((None, 1, MLP), lambda b, l: (l, 0, 0)),       # b_fc1
            pl.BlockSpec((None, MLP, H), lambda b, l: (l, 0, 0)),       # w_fc2
            pl.BlockSpec((None, 1, H), lambda b, l: (l, 0, 0)),         # b_fc2
            pl.BlockSpec((1, H), lambda b, l: (0, 0)),                  # lnf_g
            pl.BlockSpec((1, H), lambda b, l: (0, 0)),                  # lnf_b
            pl.BlockSpec((H, E), lambda b, l: (0, 0)),                  # text_proj
        ],
        out_specs=pl.BlockSpec((None, 1, E), lambda b, l: (b, 0, 0)),
        out_shape=jax.ShapeDtypeStruct((Bt, 1, E), jnp.float32),
        scratch_shapes=[pltpu.VMEM((St, H), jnp.float32)],              # residual stream
        compiler_params=pltpu.CompilerParams(
            dimension_semantics=("parallel", "arbitrary")),
    )(x0, mask,
      stk["ln1_g"], stk["ln1_b"], stk["w_qkv"], stk["b_qkv"],
      stk["wo"], stk["bo"], stk["ln2_g"], stk["ln2_b"],
      stk["w_fc1"], stk["b_fc1"], stk["w_fc2"], stk["b_fc2"],
      p["lnf_g"].reshape(1, H), p["lnf_b"].reshape(1, H), p["text_proj"])
    return out[:, 0, :]                                              # [B, E]


def clip_motion_align_forward(params, motion, lengths, input_ids, attention_mask):
    motion_emb = motion_encoder_forward(params["motion"], motion, lengths)
    text_emb = clip_text_forward(params["clip"], input_ids, attention_mask)
    return motion_emb, text_emb


# ------------------------ deterministic parameters ------------------------
def _stack_clip_layers(layers):
    st = lambda name: jnp.stack([lyr[name] for lyr in layers], axis=0)
    w_qkv = jnp.stack(
        [jnp.concatenate([l["wq"], l["wk"], l["wv"]], axis=1) for l in layers], 0)     # [L,H,3H]
    b_qkv = jnp.stack(
        [jnp.concatenate([l["bq"], l["bk"], l["bv"]], axis=0).reshape(1, 3 * H)
         for l in layers], 0)                                                          # [L,1,3H]
    return dict(
        ln1_g=st("ln1_g").reshape(NLAYERS, 1, H), ln1_b=st("ln1_b").reshape(NLAYERS, 1, H),
        w_qkv=w_qkv, b_qkv=b_qkv,
        wo=st("wo"), bo=st("bo").reshape(NLAYERS, 1, H),
        ln2_g=st("ln2_g").reshape(NLAYERS, 1, H), ln2_b=st("ln2_b").reshape(NLAYERS, 1, H),
        w_fc1=st("w_fc1"), b_fc1=st("b_fc1").reshape(NLAYERS, 1, MLP),
        w_fc2=st("w_fc2"), b_fc2=st("b_fc2").reshape(NLAYERS, 1, H),
    )


def init_params(key):
    keys = list(jax.random.split(key, 128))
    ctr = [0]

    def nxt():
        k = keys[ctr[0]]
        ctr[0] += 1
        return k

    def nrm(shape, s=0.02):
        return s * jax.random.normal(nxt(), shape, dtype=jnp.float32)

    zeros = lambda shp: jnp.zeros(shp, jnp.float32)
    ones = lambda shp: jnp.ones(shp, jnp.float32)

    motion = dict(w1=nrm((DM, HM)), b1=zeros((HM,)),
                  w2=nrm((HM, E)), b2=zeros((E,)))

    layers = []
    for _ in range(NLAYERS):
        layers.append(dict(
            ln1_g=ones((H,)), ln1_b=zeros((H,)),
            wq=nrm((H, H)), bq=zeros((H,)),
            wk=nrm((H, H)), bk=zeros((H,)),
            wv=nrm((H, H)), bv=zeros((H,)),
            wo=nrm((H, H)), bo=zeros((H,)),
            ln2_g=ones((H,)), ln2_b=zeros((H,)),
            w_fc1=nrm((H, MLP)), b_fc1=zeros((MLP,)),
            w_fc2=nrm((MLP, H)), b_fc2=zeros((H,)),
        ))

    clip = dict(token_emb=nrm((VOCAB, H)), pos_emb=nrm((S, H)),
                stacked=_stack_clip_layers(layers),
                lnf_g=ones((H,)), lnf_b=zeros((H,)),
                text_proj=nrm((H, E)))

    # nn.Parameter(log(1/temperature)); present in the module but unused in forward
    logit_scale = jnp.log(jnp.float32(1.0 / TEMP))
    return dict(motion=motion, clip=clip, logit_scale=logit_scale)


# --------------------------------- main ---------------------------------
if __name__ == "__main__":
    key = jax.random.PRNGKey(0)
    kp, km, kt = jax.random.split(key, 3)
    params = init_params(kp)

    motion = jax.random.normal(km, (B, T, DM), jnp.float32)
    lengths = jnp.array([T, 11], jnp.int32)
    input_ids = jax.random.randint(kt, (B, S), 1, VOCAB).astype(jnp.int32)
    attention_mask = jnp.array([[1] * S, [1] * 6 + [0] * 2], jnp.int32)

    fwd = jax.jit(clip_motion_align_forward)
    motion_emb, text_emb = fwd(params, motion, lengths, input_ids, attention_mask)
    jax.block_until_ready((motion_emb, text_emb))

    assert motion_emb.shape == (B, E) and motion_emb.dtype == jnp.float32
    assert text_emb.shape == (B, E) and text_emb.dtype == jnp.float32
    assert bool(jnp.all(jnp.isfinite(motion_emb))) and bool(jnp.all(jnp.isfinite(text_emb)))
    print("KERNEL_OK")
</pallas_src>

<mosaic_0001>
module attributes {stable_mosaic.version = 11 : i64} {
  func.func @_motion_kernel(%arg0: i32, %arg1: memref<32x8xf32, #tpu.memory_space<vmem>>, %arg2: memref<8x32xf32, #tpu.memory_space<vmem>>, %arg3: memref<1x32xf32, #tpu.memory_space<vmem>>, %arg4: memref<32x32xf32, #tpu.memory_space<vmem>>, %arg5: memref<1x32xf32, #tpu.memory_space<vmem>>, %arg6: memref<2x1xi32, #tpu.memory_space<vmem>>, %arg7: memref<2x32xf32, #tpu.memory_space<vmem>>) attributes {dimension_semantics = [#tpu.dimension_semantics<arbitrary>], iteration_bounds = array<i64: 1>, scalar_prefetch = 0 : i64, scratch_operands = 0 : i64, tpu.core_type = #tpu.core_type<tc>, window_params = [{pipeline_mode = #tpu.pipeline_mode<synchronous>, transform_indices = @transform_0, window_bounds = array<i64: 32, 8>}, {pipeline_mode = #tpu.pipeline_mode<synchronous>, transform_indices = @transform_1, window_bounds = array<i64: 8, 32>}, {pipeline_mode = #tpu.pipeline_mode<synchronous>, transform_indices = @transform_2, window_bounds = array<i64: 1, 32>}, {pipeline_mode = #tpu.pipeline_mode<synchronous>, transform_indices = @transform_3, window_bounds = array<i64: 32, 32>}, {pipeline_mode = #tpu.pipeline_mode<synchronous>, transform_indices = @transform_4, window_bounds = array<i64: 1, 32>}, {pipeline_mode = #tpu.pipeline_mode<synchronous>, transform_indices = @transform_5, window_bounds = array<i64: 2, 1>}, {pipeline_mode = #tpu.pipeline_mode<synchronous>, transform_indices = @transform_6, window_bounds = array<i64: 2, 32>}]} {
    %c0 = arith.constant 0 : index
    %c0_0 = arith.constant 0 : index
    %0 = vector.load %arg1[%c0, %c0_0] : memref<32x8xf32, #tpu.memory_space<vmem>>, vector<32x8xf32>
    %c0_1 = arith.constant 0 : index
    %c0_2 = arith.constant 0 : index
    %1 = vector.load %arg2[%c0_1, %c0_2] : memref<8x32xf32, #tpu.memory_space<vmem>>, vector<8x32xf32>
    %cst = arith.constant dense<0.000000e+00> : vector<32x32xf32>
    %2 = tpu.matmul %0, %1, %cst {dimension_numbers = #tpu.dot_dimension_numbers<[1], [0], [0], [1], [0, 0, 1, 1], [], []>} : vector<32x8xf32>, vector<8x32xf32>, vector<32x32xf32> -> vector<32x32xf32>
    %c0_3 = arith.constant 0 : index
    %c0_4 = arith.constant 0 : index
    %3 = vector.load %arg3[%c0_3, %c0_4] : memref<1x32xf32, #tpu.memory_space<vmem>>, vector<1x32xf32>
    %4 = vector.broadcast %3 : vector<1x32xf32> to vector<32x32xf32>
    %5 = arith.addf %2, %4 : vector<32x32xf32>
    %6 = arith.mulf %5, %5 : vector<32x32xf32>
    %7 = arith.mulf %5, %6 : vector<32x32xf32>
    %cst_5 = arith.constant 4.471500e-02 : f32
    %8 = vector.broadcast %cst_5 : f32 to vector<32x32xf32>
    %9 = arith.mulf %8, %7 : vector<32x32xf32>
    %10 = arith.addf %5, %9 : vector<32x32xf32>
    %cst_6 = arith.constant 0.797884583 : f32
    %11 = vector.broadcast %cst_6 : f32 to vector<32x32xf32>
    %12 = arith.mulf %11, %10 : vector<32x32xf32>
    %13 = math.tanh %12 : vector<32x32xf32>
    %cst_7 = arith.constant 1.000000e+00 : f32
    %14 = vector.broadcast %cst_7 : f32 to vector<32x32xf32>
    %15 = arith.addf %14, %13 : vector<32x32xf32>
    %cst_8 = arith.constant 5.000000e-01 : f32
    %16 = vector.broadcast %cst_8 : f32 to vector<32x32xf32>
    %17 = arith.mulf %16, %15 : vector<32x32xf32>
    %18 = arith.mulf %5, %17 : vector<32x32xf32>
    %c0_9 = arith.constant 0 : index
    %c0_10 = arith.constant 0 : index
    %19 = vector.load %arg4[%c0_9, %c0_10] : memref<32x32xf32, #tpu.memory_space<vmem>>, vector<32x32xf32>
    %cst_11 = arith.constant dense<0.000000e+00> : vector<32x32xf32>
    %20 = tpu.matmul %18, %19, %cst_11 {dimension_numbers = #tpu.dot_dimension_numbers<[1], [0], [0], [1], [0, 0, 1, 1], [], []>} : vector<32x32xf32>, vector<32x32xf32>, vector<32x32xf32> -> vector<32x32xf32>
    %c0_12 = arith.constant 0 : index
    %c0_13 = arith.constant 0 : index
    %21 = vector.load %arg5[%c0_12, %c0_13] : memref<1x32xf32, #tpu.memory_space<vmem>>, vector<1x32xf32>
    %22 = vector.broadcast %21 : vector<1x32xf32> to vector<32x32xf32>
    %23 = arith.addf %20, %22 : vector<32x32xf32>
    %c0_14 = arith.constant 0 : index
    %c0_15 = arith.constant 0 : index
    %24 = vector.load %arg6[%c0_14, %c0_15] : memref<2x1xi32, #tpu.memory_space<vmem>>, vector<2x1xi32>
    %25 = tpu.iota {dimensions = array<i32: 0>} : vector<2x32xi32>
    %26 = tpu.iota {dimensions = array<i32: 1>} : vector<2x32xi32>
    %c16_i32 = arith.constant 16 : i32
    %27 = vector.broadcast %c16_i32 : i32 to vector<2x32xi32>
    %28 = arith.muli %25, %27 : vector<2x32xi32>
    %29 = arith.subi %26, %28 : vector<2x32xi32>
    %c0_i32 = arith.constant 0 : i32
    %30 = vector.broadcast %c0_i32 : i32 to vector<2x32xi32>
    %31 = arith.cmpi sge, %29, %30 : vector<2x32xi32>
    %c16_i32_16 = arith.constant 16 : i32
    %32 = vector.broadcast %c16_i32_16 : i32 to vector<2x32xi32>
    %33 = arith.cmpi slt, %29, %32 : vector<2x32xi32>
    %34 = arith.andi %31, %33 : vector<2x32xi1>
    %35 = vector.broadcast %24 : vector<2x1xi32> to vector<2x32xi32>
    %36 = arith.cmpi slt, %29, %35 : vector<2x32xi32>
    %37 = arith.andi %34, %36 : vector<2x32xi1>
    %c16_i32_17 = arith.constant 16 : i32
    %38 = vector.broadcast %c16_i32_17 : i32 to vector<2x1xi32>
    %39 = arith.minsi %24, %38 : vector<2x1xi32>
    %c1_i32 = arith.constant 1 : i32
    %40 = vector.broadcast %c1_i32 : i32 to vector<2x1xi32>
    %41 = arith.maxsi %39, %40 : vector<2x1xi32>
    %42 = arith.sitofp %41 : vector<2x1xi32> to vector<2x1xf32>
    %43 = arith.extui %37 : vector<2x32xi1> to vector<2x32xi32>
    %44 = arith.sitofp %43 : vector<2x32xi32> to vector<2x32xf32>
    %45 = vector.broadcast %42 : vector<2x1xf32> to vector<2x32xf32>
    %46 = arith.divf %44, %45 : vector<2x32xf32>
    %cst_18 = arith.constant dense<0.000000e+00> : vector<2x32xf32>
    %47 = tpu.matmul %46, %23, %cst_18 {dimension_numbers = #tpu.dot_dimension_numbers<[1], [0], [0], [1], [0, 0, 1, 1], [], []>} : vector<2x32xf32>, vector<32x32xf32>, vector<2x32xf32> -> vector<2x32xf32>
    %c0_19 = arith.constant 0 : index
    %c0_20 = arith.constant 0 : index
    %48 = vector.load %arg7[%c0_19, %c0_20] : memref<2x32xf32, #tpu.memory_space<vmem>>, vector<2x32xf32>
    tpu.vector_store %arg7[%c0_19, %c0_20], %47 {strides = array<i32>} : memref<2x32xf32, #tpu.memory_space<vmem>>, vector<2x32xf32>,
    return
  }
  func.func @transform_0(%arg0: i32) -> (i32, i32) {
    %c0_i32 = arith.constant 0 : i32
    %c0_i32_0 = arith.constant 0 : i32
    %c0_i32_1 = arith.constant 0 : i32
    return %c0_i32, %c0_i32_0 : i32, i32
  }
  func.func @transform_1(%arg0: i32) -> (i32, i32) {
    %c0_i32 = arith.constant 0 : i32
    %c0_i32_0 = arith.constant 0 : i32
    %c0_i32_1 = arith.constant 0 : i32
    return %c0_i32, %c0_i32_0 : i32, i32
  }
  func.func @transform_2(%arg0: i32) -> (i32, i32) {
    %c0_i32 = arith.constant 0 : i32
    %c0_i32_0 = arith.constant 0 : i32
    %c0_i32_1 = arith.constant 0 : i32
    return %c0_i32, %c0_i32_0 : i32, i32
  }
  func.func @transform_3(%arg0: i32) -> (i32, i32) {
    %c0_i32 = arith.constant 0 : i32
    %c0_i32_0 = arith.constant 0 : i32
    %c0_i32_1 = arith.constant 0 : i32
    return %c0_i32, %c0_i32_0 : i32, i32
  }
  func.func @transform_4(%arg0: i32) -> (i32, i32) {
    %c0_i32 = arith.constant 0 : i32
    %c0_i32_0 = arith.constant 0 : i32
    %c0_i32_1 = arith.constant 0 : i32
    return %c0_i32, %c0_i32_0 : i32, i32
  }
  func.func @transform_5(%arg0: i32) -> (i32, i32) {
    %c0_i32 = arith.constant 0 : i32
    %c0_i32_0 = arith.constant 0 : i32
    %c0_i32_1 = arith.constant 0 : i32
    return %c0_i32, %c0_i32_0 : i32, i32
  }
  func.func @transform_6(%arg0: i32) -> (i32, i32) {
    %c0_i32 = arith.constant 0 : i32
    %c0_i32_0 = arith.constant 0 : i32
    %c0_i32_1 = arith.constant 0 : i32
    return %c0_i32, %c0_i32_0 : i32, i32
  }
}

module attributes {stable_mosaic.version = 11 : i64} {
  func.func @_text_tower_kernel(%arg0: i32, %arg1: i32, %arg2: memref<1x8x32xf32, #tpu.memory_space<vmem>>, %arg3: memref<1x1x8xf32, #tpu.memory_space<vmem>>, %arg4: memref<1x1x32xf32, #tpu.memory_space<vmem>>, %arg5: memref<1x1x32xf32, #tpu.memory_space<vmem>>, %arg6: memref<1x32x96xf32, #tpu.memory_space<vmem>>, %arg7: memref<1x1x96xf32, #tpu.memory_space<vmem>>, %arg8: memref<1x32x32xf32, #tpu.memory_space<vmem>>, %arg9: memref<1x1x32xf32, #tpu.memory_space<vmem>>, %arg10: memref<1x1x32xf32, #tpu.memory_space<vmem>>, %arg11: memref<1x1x32xf32, #tpu.memory_space<vmem>>, %arg12: memref<1x32x128xf32, #tpu.memory_space<vmem>>, %arg13: memref<1x1x128xf32, #tpu.memory_space<vmem>>, %arg14: memref<1x128x32xf32, #tpu.memory_space<vmem>>, %arg15: memref<1x1x32xf32, #tpu.memory_space<vmem>>, %arg16: memref<1x32xf32, #tpu.memory_space<vmem>>, %arg17: memref<1x32xf32, #tpu.memory_space<vmem>>, %arg18: memref<32x32xf32, #tpu.memory_space<vmem>>, %arg19: memref<1x1x32xf32, #tpu.memory_space<vmem>>, %arg20: memref<8x32xf32, #tpu.memory_space<vmem>>) attributes {dimension_semantics = [#tpu.dimension_semantics<parallel>, #tpu.dimension_semantics<arbitrary>], iteration_bounds = array<i64: 2, 2>, scalar_prefetch = 0 : i64, scratch_operands = 1 : i64, tpu.core_type = #tpu.core_type<tc>, window_params = [{transform_indices = @transform_0, window_bounds = array<i64: 1, 8, 32>}, {transform_indices = @transform_1, window_bounds = array<i64: 1, 1, 8>}, {transform_indices = @transform_2, window_bounds = array<i64: 1, 1, 32>}, {transform_indices = @transform_3, window_bounds = array<i64: 1, 1, 32>}, {transform_indices = @transform_4, window_bounds = array<i64: 1, 32, 96>}, {transform_indices = @transform_5, window_bounds = array<i64: 1, 1, 96>}, {transform_indices = @transform_6, window_bounds = array<i64: 1, 32, 32>}, {transform_indices = @transform_7, window_bounds = array<i64: 1, 1, 32>}, {transform_indices = @transform_8, window_bounds = array<i64: 1, 1, 32>}, {transform_indices = @transform_9, window_bounds = array<i64: 1, 1, 32>}, {transform_indices = @transform_10, window_bounds = array<i64: 1, 32, 128>}, {transform_indices = @transform_11, window_bounds = array<i64: 1, 1, 128>}, {transform_indices = @transform_12, window_bounds = array<i64: 1, 128, 32>}, {transform_indices = @transform_13, window_bounds = array<i64: 1, 1, 32>}, {pipeline_mode = #tpu.pipeline_mode<synchronous>, transform_indices = @transform_14, window_bounds = array<i64: 1, 32>}, {pipeline_mode = #tpu.pipeline_mode<synchronous>, transform_indices = @transform_15, window_bounds = array<i64: 1, 32>}, {pipeline_mode = #tpu.pipeline_mode<synchronous>, transform_indices = @transform_16, window_bounds = array<i64: 32, 32>}, {transform_indices = @transform_17, window_bounds = array<i64: 1, 1, 32>}]} {
    %c0_i32 = arith.constant 0 : i32
    %0 = arith.cmpi eq, %arg1, %c0_i32 : i32
    %1 = arith.extui %0 : i1 to i32
    %c0_i32_0 = arith.constant 0 : i32
    %2 = arith.cmpi ne, %1, %c0_i32_0 : i32
    scf.if %2 {
      %c0_86 = arith.constant 0 : index
      %c0_87 = arith.constant 0 : index
      %c0_88 = arith.constant 0 : index
      %197 = vector.load %arg2[%c0_86, %c0_87, %c0_88] : memref<1x8x32xf32, #tpu.memory_space<vmem>>, vector<1x8x32xf32>
      %198 = vector.shape_cast %197 : vector<1x8x32xf32> to vector<8x32xf32>
      %c0_89 = arith.constant 0 : index
      %c0_90 = arith.constant 0 : index
      %199 = vector.load %arg20[%c0_89, %c0_90] : memref<8x32xf32, #tpu.memory_space<vmem>>, vector<8x32xf32>
      tpu.vector_store %arg20[%c0_89, %c0_90], %198 {strides = array<i32>} : memref<8x32xf32, #tpu.memory_space<vmem>>, vector<8x32xf32>,
    } else {
    }
    %c0 = arith.constant 0 : index
    %c0_1 = arith.constant 0 : index
    %3 = vector.load %arg20[%c0, %c0_1] : memref<8x32xf32, #tpu.memory_space<vmem>>, vector<8x32xf32>
    %c0_2 = arith.constant 0 : index
    %c0_3 = arith.constant 0 : index
    %c0_4 = arith.constant 0 : index
    %4 = vector.load %arg3[%c0_2, %c0_3, %c0_4] : memref<1x1x8xf32, #tpu.memory_space<vmem>>, vector<1x1x8xf32>
    %5 = vector.shape_cast %4 : vector<1x1x8xf32> to vector<1x8xf32>
    %c0_5 = arith.constant 0 : index
    %c0_6 = arith.constant 0 : index
    %c0_7 = arith.constant 0 : index
    %6 = vector.load %arg4[%c0_5, %c0_6, %c0_7] : memref<1x1x32xf32, #tpu.memory_space<vmem>>, vector<1x1x32xf32>
    %7 = vector.shape_cast %6 : vector<1x1x32xf32> to vector<1x32xf32>
    %c0_8 = arith.constant 0 : index
    %c0_9 = arith.constant 0 : index
    %c0_10 = arith.constant 0 : index
    %8 = vector.load %arg5[%c0_8, %c0_9, %c0_10] : memref<1x1x32xf32, #tpu.memory_space<vmem>>, vector<1x1x32xf32>
    %9 = vector.shape_cast %8 : vector<1x1x32xf32> to vector<1x32xf32>
    %cst = arith.constant dense<0.000000e+00> : vector<8xf32>
    %10 = vector.multi_reduction <add>, %3, %cst [1] : vector<8x32xf32> to vector<8xf32>
    %11 = vector.shape_cast %10 : vector<8xf32> to vector<8x1xf32>
    %cst_11 = arith.constant 3.200000e+01 : f32
    %12 = vector.broadcast %cst_11 : f32 to vector<8x1xf32>
    %13 = arith.divf %11, %12 : vector<8x1xf32>
    %14 = vector.broadcast %13 : vector<8x1xf32> to vector<8x32xf32>
    %15 = arith.subf %3, %14 : vector<8x32xf32>
    %16 = arith.mulf %15, %15 : vector<8x32xf32>
    %cst_12 = arith.constant dense<0.000000e+00> : vector<8xf32>
    %17 = vector.multi_reduction <add>, %16, %cst_12 [1] : vector<8x32xf32> to vector<8xf32>
    %18 = vector.shape_cast %17 : vector<8xf32> to vector<8x1xf32>
    %cst_13 = arith.constant 3.200000e+01 : f32
    %19 = vector.broadcast %cst_13 : f32 to vector<8x1xf32>
    %20 = arith.divf %18, %19 : vector<8x1xf32>
    %21 = vector.broadcast %13 : vector<8x1xf32> to vector<8x32xf32>
    %22 = arith.subf %3, %21 : vector<8x32xf32>
    %cst_14 = arith.constant 9.99999974E-6 : f32
    %23 = vector.broadcast %cst_14 : f32 to vector<8x1xf32>
    %24 = arith.addf %20, %23 : vector<8x1xf32>
    %25 = math.rsqrt %24 : vector<8x1xf32>
    %26 = vector.broadcast %25 : vector<8x1xf32> to vector<8x32xf32>
    %27 = arith.mulf %22, %26 : vector<8x32xf32>
    %28 = vector.broadcast %7 : vector<1x32xf32> to vector<8x32xf32>
    %29 = arith.mulf %27, %28 : vector<8x32xf32>
    %30 = vector.broadcast %9 : vector<1x32xf32> to vector<8x32xf32>
    %31 = arith.addf %29, %30 : vector<8x32xf32>
    %c0_15 = arith.constant 0 : index
    %c0_16 = arith.constant 0 : index
    %c0_17 = arith.constant 0 : index
    %32 = vector.load %arg6[%c0_15, %c0_16, %c0_17] : memref<1x32x96xf32, #tpu.memory_space<vmem>>, vector<1x32x96xf32>
    %33 = vector.shape_cast %32 : vector<1x32x96xf32> to vector<32x96xf32>
    %cst_18 = arith.constant dense<0.000000e+00> : vector<8x96xf32>
    %34 = tpu.matmul %31, %33, %cst_18 {dimension_numbers = #tpu.dot_dimension_numbers<[1], [0], [0], [1], [0, 0, 1, 1], [], []>} : vector<8x32xf32>, vector<32x96xf32>, vector<8x96xf32> -> vector<8x96xf32>
    %c0_19 = arith.constant 0 : index
    %c0_20 = arith.constant 0 : index
    %c0_21 = arith.constant 0 : index
    %35 = vector.load %arg7[%c0_19, %c0_20, %c0_21] : memref<1x1x96xf32, #tpu.memory_space<vmem>>, vector<1x1x96xf32>
    %36 = vector.shape_cast %35 : vector<1x1x96xf32> to vector<1x96xf32>
    %37 = vector.broadcast %36 : vector<1x96xf32> to vector<8x96xf32>
    %38 = arith.addf %34, %37 : vector<8x96xf32>
    %39 = vector.extract_strided_slice %38 {offsets = [0, 0], sizes = [8, 32], strides = [1, 1]} : vector<8x96xf32> to vector<8x32xf32>
    %40 = vector.extract_strided_slice %38 {offsets = [0, 32], sizes = [8, 32], strides = [1, 1]} : vector<8x96xf32> to vector<8x32xf32>
    %41 = vector.extract_strided_slice %38 {offsets = [0, 64], sizes = [8, 32], strides = [1, 1]} : vector<8x96xf32> to vector<8x32xf32>
    %42 = tpu.iota {dimensions = array<i32: 0>} : vector<8x8xi32>
    %43 = tpu.iota {dimensions = array<i32: 1>} : vector<8x8xi32>
    %44 = arith.cmpi sle, %43, %42 : vector<8x8xi32>
    %cst_22 = arith.constant 5.000000e-01 : f32
    %45 = vector.broadcast %cst_22 : f32 to vector<1x8xf32>
    %46 = arith.cmpf ogt, %5, %45 : vector<1x8xf32>
    %47 = vector.broadcast %46 : vector<1x8xi1> to vector<8x8xi1>
    %48 = arith.andi %44, %47 : vector<8x8xi1>
    %cst_23 = arith.constant 0.000000e+00 : f32
    %cst_24 = arith.constant -1.000000e+09 : f32
    %49 = vector.broadcast %cst_23 : f32 to vector<8x8xf32>
    %50 = vector.broadcast %cst_24 : f32 to vector<8x8xf32>
    %51 = arith.select %48, %49, %50 : vector<8x8xi1>, vector<8x8xf32>
    %c0_25 = arith.constant 0 : index
    %c0_26 = arith.constant 0 : index
    %c0_27 = arith.constant 0 : index
    %52 = vector.load %arg8[%c0_25, %c0_26, %c0_27] : memref<1x32x32xf32, #tpu.memory_space<vmem>>, vector<1x32x32xf32>
    %53 = vector.shape_cast %52 : vector<1x32x32xf32> to vector<32x32xf32>
    %cst_28 = arith.constant 0.000000e+00 : f32
    %54 = vector.broadcast %cst_28 : f32 to vector<8x32xf32>
    %55 = vector.extract_strided_slice %39 {offsets = [0, 0], sizes = [8, 8], strides = [1, 1]} : vector<8x32xf32> to vector<8x8xf32>
    %56 = vector.extract_strided_slice %40 {offsets = [0, 0], sizes = [8, 8], strides = [1, 1]} : vector<8x32xf32> to vector<8x8xf32>
    %57 = vector.extract_strided_slice %41 {offsets = [0, 0], sizes = [8, 8], strides = [1, 1]} : vector<8x32xf32> to vector<8x8xf32>
    %cst_29 = arith.constant dense<0.000000e+00> : vector<8x8xf32>
    %58 = tpu.matmul %55, %56, %cst_29 {dimension_numbers = #tpu.dot_dimension_numbers<[1], [1], [0], [0], [0, 0, 1, 0], [], []>} : vector<8x8xf32>, vector<8x8xf32>, vector<8x8xf32> -> vector<8x8xf32>
    %cst_30 = arith.constant 0.353553385 : f32
    %59 = vector.broadcast %cst_30 : f32 to vector<8x8xf32>
    %60 = arith.mulf %58, %59 : vector<8x8xf32>
    %61 = arith.addf %60, %51 : vector<8x8xf32>
    %cst_31 = arith.constant dense<0xFF800000> : vector<8xf32>
    %62 = vector.multi_reduction <maximumf>, %61, %cst_31 [1] : vector<8x8xf32> to vector<8xf32>
    %63 = vector.shape_cast %62 : vector<8xf32> to vector<8x1xf32>
    %64 = vector.broadcast %63 : vector<8x1xf32> to vector<8x8xf32>
    %65 = arith.subf %61, %64 : vector<8x8xf32>
    %66 = math.exp %65 : vector<8x8xf32>
    %cst_32 = arith.constant dense<0.000000e+00> : vector<8xf32>
    %67 = vector.multi_reduction <add>, %66, %cst_32 [1] : vector<8x8xf32> to vector<8xf32>
    %68 = vector.shape_cast %67 : vector<8xf32> to vector<8x1xf32>
    %69 = tpu.reciprocal %68 {approx = true} : vector<8x1xf32> -> vector<8x1xf32>
    %70 = vector.broadcast %69 : vector<8x1xf32> to vector<8x8xf32>
    %71 = arith.mulf %66, %70 : vector<8x8xf32>
    %cst_33 = arith.constant dense<0.000000e+00> : vector<8x8xf32>
    %72 = tpu.matmul %71, %57, %cst_33 {dimension_numbers = #tpu.dot_dimension_numbers<[1], [0], [0], [1], [0, 0, 1, 1], [], []>} : vector<8x8xf32>, vector<8x8xf32>, vector<8x8xf32> -> vector<8x8xf32>
    %73 = vector.extract_strided_slice %53 {offsets = [0, 0], sizes = [8, 32], strides = [1, 1]} : vector<32x32xf32> to vector<8x32xf32>
    %cst_34 = arith.constant dense<0.000000e+00> : vector<8x32xf32>
    %74 = tpu.matmul %72, %73, %cst_34 {dimension_numbers = #tpu.dot_dimension_numbers<[1], [0], [0], [1], [0, 0, 1, 1], [], []>} : vector<8x8xf32>, vector<8x32xf32>, vector<8x32xf32> -> vector<8x32xf32>
    %75 = arith.addf %54, %74 : vector<8x32xf32>
    %76 = vector.extract_strided_slice %39 {offsets = [0, 8], sizes = [8, 8], strides = [1, 1]} : vector<8x32xf32> to vector<8x8xf32>
    %77 = vector.extract_strided_slice %40 {offsets = [0, 8], sizes = [8, 8], strides = [1, 1]} : vector<8x32xf32> to vector<8x8xf32>
    %78 = vector.extract_strided_slice %41 {offsets = [0, 8], sizes = [8, 8], strides = [1, 1]} : vector<8x32xf32> to vector<8x8xf32>
    %cst_35 = arith.constant dense<0.000000e+00> : vector<8x8xf32>
    %79 = tpu.matmul %76, %77, %cst_35 {dimension_numbers = #tpu.dot_dimension_numbers<[1], [1], [0], [0], [0, 0, 1, 0], [], []>} : vector<8x8xf32>, vector<8x8xf32>, vector<8x8xf32> -> vector<8x8xf32>
    %cst_36 = arith.constant 0.353553385 : f32
    %80 = vector.broadcast %cst_36 : f32 to vector<8x8xf32>
    %81 = arith.mulf %79, %80 : vector<8x8xf32>
    %82 = arith.addf %81, %51 : vector<8x8xf32>
    %cst_37 = arith.constant dense<0xFF800000> : vector<8xf32>
    %83 = vector.multi_reduction <maximumf>, %82, %cst_37 [1] : vector<8x8xf32> to vector<8xf32>
    %84 = vector.shape_cast %83 : vector<8xf32> to vector<8x1xf32>
    %85 = vector.broadcast %84 : vector<8x1xf32> to vector<8x8xf32>
    %86 = arith.subf %82, %85 : vector<8x8xf32>
    %87 = math.exp %86 : vector<8x8xf32>
    %cst_38 = arith.constant dense<0.000000e+00> : vector<8xf32>
    %88 = vector.multi_reduction <add>, %87, %cst_38 [1] : vector<8x8xf32> to vector<8xf32>
    %89 = vector.shape_cast %88 : vector<8xf32> to vector<8x1xf32>
    %90 = tpu.reciprocal %89 {approx = true} : vector<8x1xf32> -> vector<8x1xf32>
    %91 = vector.broadcast %90 : vector<8x1xf32> to vector<8x8xf32>
    %92 = arith.mulf %87, %91 : vector<8x8xf32>
    %cst_39 = arith.constant dense<0.000000e+00> : vector<8x8xf32>
    %93 = tpu.matmul %92, %78, %cst_39 {dimension_numbers = #tpu.dot_dimension_numbers<[1], [0], [0], [1], [0, 0, 1, 1], [], []>} : vector<8x8xf32>, vector<8x8xf32>, vector<8x8xf32> -> vector<8x8xf32>
    %94 = vector.extract_strided_slice %53 {offsets = [8, 0], sizes = [8, 32], strides = [1, 1]} : vector<32x32xf32> to vector<8x32xf32>
    %cst_40 = arith.constant dense<0.000000e+00> : vector<8x32xf32>
    %95 = tpu.matmul %93, %94, %cst_40 {dimension_numbers = #tpu.dot_dimension_numbers<[1], [0], [0], [1], [0, 0, 1, 1], [], []>} : vector<8x8xf32>, vector<8x32xf32>, vector<8x32xf32> -> vector<8x32xf32>
    %96 = arith.addf %75, %95 : vector<8x32xf32>
    %97 = vector.extract_strided_slice %39 {offsets = [0, 16], sizes = [8, 8], strides = [1, 1]} : vector<8x32xf32> to vector<8x8xf32>
    %98 = vector.extract_strided_slice %40 {offsets = [0, 16], sizes = [8, 8], strides = [1, 1]} : vector<8x32xf32> to vector<8x8xf32>
    %99 = vector.extract_strided_slice %41 {offsets = [0, 16], sizes = [8, 8], strides = [1, 1]} : vector<8x32xf32> to vector<8x8xf32>
    %cst_41 = arith.constant dense<0.000000e+00> : vector<8x8xf32>
    %100 = tpu.matmul %97, %98, %cst_41 {dimension_numbers = #tpu.dot_dimension_numbers<[1], [1], [0], [0], [0, 0, 1, 0], [], []>} : vector<8x8xf32>, vector<8x8xf32>, vector<8x8xf32> -> vector<8x8xf32>
    %cst_42 = arith.constant 0.353553385 : f32
    %101 = vector.broadcast %cst_42 : f32 to vector<8x8xf32>
    %102 = arith.mulf %100, %101 : vector<8x8xf32>
    %103 = arith.addf %102, %51 : vector<8x8xf32>
    %cst_43 = arith.constant dense<0xFF800000> : vector<8xf32>
    %104 = vector.multi_reduction <maximumf>, %103, %cst_43 [1] : vector<8x8xf32> to vector<8xf32>
    %105 = vector.shape_cast %104 : vector<8xf32> to vector<8x1xf32>
    %106 = vector.broadcast %105 : vector<8x1xf32> to vector<8x8xf32>
    %107 = arith.subf %103, %106 : vector<8x8xf32>
    %108 = math.exp %107 : vector<8x8xf32>
    %cst_44 = arith.constant dense<0.000000e+00> : vector<8xf32>
    %109 = vector.multi_reduction <add>, %108, %cst_44 [1] : vector<8x8xf32> to vector<8xf32>
    %110 = vector.shape_cast %109 : vector<8xf32> to vector<8x1xf32>
    %111 = tpu.reciprocal %110 {approx = true} : vector<8x1xf32> -> vector<8x1xf32>
    %112 = vector.broadcast %111 : vector<8x1xf32> to vector<8x8xf32>
    %113 = arith.mulf %108, %112 : vector<8x8xf32>
    %cst_45 = arith.constant dense<0.000000e+00> : vector<8x8xf32>
    %114 = tpu.matmul %113, %99, %cst_45 {dimension_numbers = #tpu.dot_dimension_numbers<[1], [0], [0], [1], [0, 0, 1, 1], [], []>} : vector<8x8xf32>, vector<8x8xf32>, vector<8x8xf32> -> vector<8x8xf32>
    %115 = vector.extract_strided_slice %53 {offsets = [16, 0], sizes = [8, 32], strides = [1, 1]} : vector<32x32xf32> to vector<8x32xf32>
    %cst_46 = arith.constant dense<0.000000e+00> : vector<8x32xf32>
    %116 = tpu.matmul %114, %115, %cst_46 {dimension_numbers = #tpu.dot_dimension_numbers<[1], [0], [0], [1], [0, 0, 1, 1], [], []>} : vector<8x8xf32>, vector<8x32xf32>, vector<8x32xf32> -> vector<8x32xf32>
    %117 = arith.addf %96, %116 : vector<8x32xf32>
    %118 = vector.extract_strided_slice %39 {offsets = [0, 24], sizes = [8, 8], strides = [1, 1]} : vector<8x32xf32> to vector<8x8xf32>
    %119 = vector.extract_strided_slice %40 {offsets = [0, 24], sizes = [8, 8], strides = [1, 1]} : vector<8x32xf32> to vector<8x8xf32>
    %120 = vector.extract_strided_slice %41 {offsets = [0, 24], sizes = [8, 8], strides = [1, 1]} : vector<8x32xf32> to vector<8x8xf32>
    %cst_47 = arith.constant dense<0.000000e+00> : vector<8x8xf32>
    %121 = tpu.matmul %118, %119, %cst_47 {dimension_numbers = #tpu.dot_dimension_numbers<[1], [1], [0], [0], [0, 0, 1, 0], [], []>} : vector<8x8xf32>, vector<8x8xf32>, vector<8x8xf32> -> vector<8x8xf32>
    %cst_48 = arith.constant 0.353553385 : f32
    %122 = vector.broadcast %cst_48 : f32 to vector<8x8xf32>
    %123 = arith.mulf %121, %122 : vector<8x8xf32>
    %124 = arith.addf %123, %51 : vector<8x8xf32>
    %cst_49 = arith.constant dense<0xFF800000> : vector<8xf32>
    %125 = vector.multi_reduction <maximumf>, %124, %cst_49 [1] : vector<8x8xf32> to vector<8xf32>
    %126 = vector.shape_cast %125 : vector<8xf32> to vector<8x1xf32>
    %127 = vector.broadcast %126 : vector<8x1xf32> to vector<8x8xf32>
    %128 = arith.subf %124, %127 : vector<8x8xf32>
    %129 = math.exp %128 : vector<8x8xf32>
    %cst_50 = arith.constant dense<0.000000e+00> : vector<8xf32>
    %130 = vector.multi_reduction <add>, %129, %cst_50 [1] : vector<8x8xf32> to vector<8xf32>
    %131 = vector.shape_cast %130 : vector<8xf32> to vector<8x1xf32>
    %132 = tpu.reciprocal %131 {approx = true} : vector<8x1xf32> -> vector<8x1xf32>
    %133 = vector.broadcast %132 : vector<8x1xf32> to vector<8x8xf32>
    %134 = arith.mulf %129, %133 : vector<8x8xf32>
    %cst_51 = arith.constant dense<0.000000e+00> : vector<8x8xf32>
    %135 = tpu.matmul %134, %120, %cst_51 {dimension_numbers = #tpu.dot_dimension_numbers<[1], [0], [0], [1], [0, 0, 1, 1], [], []>} : vector<8x8xf32>, vector<8x8xf32>, vector<8x8xf32> -> vector<8x8xf32>
    %136 = vector.extract_strided_slice %53 {offsets = [24, 0], sizes = [8, 32], strides = [1, 1]} : vector<32x32xf32> to vector<8x32xf32>
    %cst_52 = arith.constant dense<0.000000e+00> : vector<8x32xf32>
    %137 = tpu.matmul %135, %136, %cst_52 {dimension_numbers = #tpu.dot_dimension_numbers<[1], [0], [0], [1], [0, 0, 1, 1], [], []>} : vector<8x8xf32>, vector<8x32xf32>, vector<8x32xf32> -> vector<8x32xf32>
    %138 = arith.addf %117, %137 : vector<8x32xf32>
    %139 = arith.addf %3, %138 : vector<8x32xf32>
    %c0_53 = arith.constant 0 : index
    %c0_54 = arith.constant 0 : index
    %c0_55 = arith.constant 0 : index
    %140 = vector.load %arg9[%c0_53, %c0_54, %c0_55] : memref<1x1x32xf32, #tpu.memory_space<vmem>>, vector<1x1x32xf32>
    %141 = vector.shape_cast %140 : vector<1x1x32xf32> to vector<1x32xf32>
    %142 = vector.broadcast %141 : vector<1x32xf32> to vector<8x32xf32>
    %143 = arith.addf %139, %142 : vector<8x32xf32>
    %c0_56 = arith.constant 0 : index
    %c0_57 = arith.constant 0 : index
    %c0_58 = arith.constant 0 : index
    %144 = vector.load %arg10[%c0_56, %c0_57, %c0_58] : memref<1x1x32xf32, #tpu.memory_space<vmem>>, vector<1x1x32xf32>
    %145 = vector.shape_cast %144 : vector<1x1x32xf32> to vector<1x32xf32>
    %c0_59 = arith.constant 0 : index
    %c0_60 = arith.constant 0 : index
    %c0_61 = arith.constant 0 : index
    %146 = vector.load %arg11[%c0_59, %c0_60, %c0_61] : memref<1x1x32xf32, #tpu.memory_space<vmem>>, vector<1x1x32xf32>
    %147 = vector.shape_cast %146 : vector<1x1x32xf32> to vector<1x32xf32>
    %cst_62 = arith.constant dense<0.000000e+00> : vector<8xf32>
    %148 = vector.multi_reduction <add>, %143, %cst_62 [1] : vector<8x32xf32> to vector<8xf32>
    %149 = vector.shape_cast %148 : vector<8xf32> to vector<8x1xf32>
    %cst_63 = arith.constant 3.200000e+01 : f32
    %150 = vector.broadcast %cst_63 : f32 to vector<8x1xf32>
    %151 = arith.divf %149, %150 : vector<8x1xf32>
    %152 = vector.broadcast %151 : vector<8x1xf32> to vector<8x32xf32>
    %153 = arith.subf %143, %152 : vector<8x32xf32>
    %154 = arith.mulf %153, %153 : vector<8x32xf32>
    %cst_64 = arith.constant dense<0.000000e+00> : vector<8xf32>
    %155 = vector.multi_reduction <add>, %154, %cst_64 [1] : vector<8x32xf32> to vector<8xf32>
    %156 = vector.shape_cast %155 : vector<8xf32> to vector<8x1xf32>
    %cst_65 = arith.constant 3.200000e+01 : f32
    %157 = vector.broadcast %cst_65 : f32 to vector<8x1xf32>
    %158 = arith.divf %156, %157 : vector<8x1xf32>
    %159 = vector.broadcast %151 : vector<8x1xf32> to vector<8x32xf32>
    %160 = arith.subf %143, %159 : vector<8x32xf32>
    %cst_66 = arith.constant 9.99999974E-6 : f32
    %161 = vector.broadcast %cst_66 : f32 to vector<8x1xf32>
    %162 = arith.addf %158, %161 : vector<8x1xf32>
    %163 = math.rsqrt %162 : vector<8x1xf32>
    %164 = vector.broadcast %163 : vector<8x1xf32> to vector<8x32xf32>
    %165 = arith.mulf %160, %164 : vector<8x32xf32>
    %166 = vector.broadcast %145 : vector<1x32xf32> to vector<8x32xf32>
    %167 = arith.mulf %165, %166 : vector<8x32xf32>
    %168 = vector.broadcast %147 : vector<1x32xf32> to vector<8x32xf32>
    %169 = arith.addf %167, %168 : vector<8x32xf32>
    %c0_67 = arith.constant 0 : index
    %c0_68 = arith.constant 0 : index
    %c0_69 = arith.constant 0 : index
    %170 = vector.load %arg12[%c0_67, %c0_68, %c0_69] : memref<1x32x128xf32, #tpu.memory_space<vmem>>, vector<1x32x128xf32>
    %171 = vector.shape_cast %170 : vector<1x32x128xf32> to vector<32x128xf32>
    %cst_70 = arith.constant dense<0.000000e+00> : vector<8x128xf32>
    %172 = tpu.matmul %169, %171, %cst_70 {dimension_numbers = #tpu.dot_dimension_numbers<[1], [0], [0], [1], [0, 0, 1, 1], [], []>} : vector<8x32xf32>, vector<32x128xf32>, vector<8x128xf32> -> vector<8x128xf32>
    %c0_71 = arith.constant 0 : index
    %c0_72 = arith.constant 0 : index
    %c0_73 = arith.constant 0 : index
    %173 = vector.load %arg13[%c0_71, %c0_72, %c0_73] : memref<1x1x128xf32, #tpu.memory_space<vmem>>, vector<1x1x128xf32>
    %174 = vector.shape_cast %173 : vector<1x1x128xf32> to vector<1x128xf32>
    %175 = vector.broadcast %174 : vector<1x128xf32> to vector<8x128xf32>
    %176 = arith.addf %172, %175 : vector<8x128xf32>
    %cst_74 = arith.constant 1.702000e+00 : f32
    %177 = vector.broadcast %cst_74 : f32 to vector<8x128xf32>
    %178 = arith.mulf %177, %176 : vector<8x128xf32>
    %179 = arith.negf %178 : vector<8x128xf32>
    %180 = math.exp %179 : vector<8x128xf32>
    %cst_75 = arith.constant 1.000000e+00 : f32
    %181 = vector.broadcast %cst_75 : f32 to vector<8x128xf32>
    %182 = arith.addf %181, %180 : vector<8x128xf32>
    %183 = arith.divf %181, %182 : vector<8x128xf32>
    %184 = arith.mulf %176, %183 : vector<8x128xf32>
    %c0_76 = arith.constant 0 : index
    %c0_77 = arith.constant 0 : index
    %c0_78 = arith.constant 0 : index
    %185 = vector.load %arg14[%c0_76, %c0_77, %c0_78] : memref<1x128x32xf32, #tpu.memory_space<vmem>>, vector<1x128x32xf32>
    %186 = vector.shape_cast %185 : vector<1x128x32xf32> to vector<128x32xf32>
    %cst_79 = arith.constant dense<0.000000e+00> : vector<8x32xf32>
    %187 = tpu.matmul %184, %186, %cst_79 {dimension_numbers = #tpu.dot_dimension_numbers<[1], [0], [0], [1], [0, 0, 1, 1], [], []>} : vector<8x128xf32>, vector<128x32xf32>, vector<8x32xf32> -> vector<8x32xf32>
    %188 = arith.addf %143, %187 : vector<8x32xf32>
    %c0_80 = arith.constant 0 : index
    %c0_81 = arith.constant 0 : index
    %c0_82 = arith.constant 0 : index
    %189 = vector.load %arg15[%c0_80, %c0_81, %c0_82] : memref<1x1x32xf32, #tpu.memory_space<vmem>>, vector<1x1x32xf32>
    %190 = vector.shape_cast %189 : vector<1x1x32xf32> to vector<1x32xf32>
    %191 = vector.broadcast %190 : vector<1x32xf32> to vector<8x32xf32>
    %192 = arith.addf %188, %191 : vector<8x32xf32>
    %c0_83 = arith.constant 0 : index
    %c0_84 = arith.constant 0 : index
    %193 = vector.load %arg20[%c0_83, %c0_84] : memref<8x32xf32, #tpu.memory_space<vmem>>, vector<8x32xf32>
    tpu.vector_store %arg20[%c0_83, %c0_84], %192 {strides = array<i32>} : memref<8x32xf32, #tpu.memory_space<vmem>>, vector<8x32xf32>,
    %c1_i32 = arith.constant 1 : i32
    %194 = arith.cmpi eq, %arg1, %c1_i32 : i32
    %195 = arith.extui %194 : i1 to i32
    %c0_i32_85 = arith.constant 0 : i32
    %196 = arith.cmpi ne, %195, %c0_i32_85 : i32
    scf.if %196 {
      %c0_86 = arith.constant 0 : index
      %c0_87 = arith.constant 0 : index
      %197 = vector.load %arg16[%c0_86, %c0_87] : memref<1x32xf32, #tpu.memory_space<vmem>>, vector<1x32xf32>
      %c0_88 = arith.constant 0 : index
      %c0_89 = arith.constant 0 : index
      %198 = vector.load %arg17[%c0_88, %c0_89] : memref<1x32xf32, #tpu.memory_space<vmem>>, vector<1x32xf32>
      %cst_90 = arith.constant dense<0.000000e+00> : vector<8xf32>
      %199 = vector.multi_reduction <add>, %192, %cst_90 [1] : vector<8x32xf32> to vector<8xf32>
      %200 = vector.shape_cast %199 : vector<8xf32> to vector<8x1xf32>
      %cst_91 = arith.constant 3.200000e+01 : f32
      %201 = vector.broadcast %cst_91 : f32 to vector<8x1xf32>
      %202 = arith.divf %200, %201 : vector<8x1xf32>
      %203 = vector.broadcast %202 : vector<8x1xf32> to vector<8x32xf32>
      %204 = arith.subf %192, %203 : vector<8x32xf32>
      %205 = arith.mulf %204, %204 : vector<8x32xf32>
      %cst_92 = arith.constant dense<0.000000e+00> : vector<8xf32>
      %206 = vector.multi_reduction <add>, %205, %cst_92 [1] : vector<8x32xf32> to vector<8xf32>
      %207 = vector.shape_cast %206 : vector<8xf32> to vector<8x1xf32>
      %cst_93 = arith.constant 3.200000e+01 : f32
      %208 = vector.broadcast %cst_93 : f32 to vector<8x1xf32>
      %209 = arith.divf %207, %208 : vector<8x1xf32>
      %210 = vector.broadcast %202 : vector<8x1xf32> to vector<8x32xf32>
      %211 = arith.subf %192, %210 : vector<8x32xf32>
      %cst_94 = arith.constant 9.99999974E-6 : f32
      %212 = vector.broadcast %cst_94 : f32 to vector<8x1xf32>
      %213 = arith.addf %209, %212 : vector<8x1xf32>
      %214 = math.rsqrt %213 : vector<8x1xf32>
      %215 = vector.broadcast %214 : vector<8x1xf32> to vector<8x32xf32>
      %216 = arith.mulf %211, %215 : vector<8x32xf32>
      %217 = vector.broadcast %197 : vector<1x32xf32> to vector<8x32xf32>
      %218 = arith.mulf %216, %217 : vector<8x32xf32>
      %219 = vector.broadcast %198 : vector<1x32xf32> to vector<8x32xf32>
      %220 = arith.addf %218, %219 : vector<8x32xf32>
      %cst_95 = arith.constant dense<0.000000e+00> : vector<1xf32>
      %221 = vector.multi_reduction <add>, %5, %cst_95 [1] : vector<1x8xf32> to vector<1xf32>
      %222 = vector.shape_cast %221 : vector<1xf32> to vector<1x1xf32>
      %223 = tpu.iota {dimensions = array<i32: 1>} : vector<1x8xi32>
      %224 = arith.sitofp %223 : vector<1x8xi32> to vector<1x8xf32>
      %cst_96 = arith.constant 1.000000e+00 : f32
      %225 = vector.broadcast %cst_96 : f32 to vector<1x1xf32>
      %226 = arith.subf %222, %225 : vector<1x1xf32>
      %227 = vector.broadcast %226 : vector<1x1xf32> to vector<1x8xf32>
      %228 = arith.subf %224, %227 : vector<1x8xf32>
      %229 = math.absf %228 : vector<1x8xf32>
      %cst_97 = arith.constant 5.000000e-01 : f32
      %230 = vector.broadcast %cst_97 : f32 to vector<1x8xf32>
      %231 = arith.cmpf olt, %229, %230 : vector<1x8xf32>
      %232 = arith.extui %231 : vector<1x8xi1> to vector<1x8xi32>
      %233 = arith.sitofp %232 : vector<1x8xi32> to vector<1x8xf32>
      %cst_98 = arith.constant dense<0.000000e+00> : vector<1x32xf32>
      %234 = tpu.matmul %233, %220, %cst_98 {dimension_numbers = #tpu.dot_dimension_numbers<[1], [0], [0], [1], [0, 0, 1, 1], [], []>} : vector<1x8xf32>, vector<8x32xf32>, vector<1x32xf32> -> vector<1x32xf32>
      %c0_99 = arith.constant 0 : index
      %c0_100 = arith.constant 0 : index
      %235 = vector.load %arg18[%c0_99, %c0_100] : memref<32x32xf32, #tpu.memory_space<vmem>>, vector<32x32xf32>
      %cst_101 = arith.constant dense<0.000000e+00> : vector<1x32xf32>
      %236 = tpu.matmul %234, %235, %cst_101 {dimension_numbers = #tpu.dot_dimension_numbers<[1], [0], [0], [1], [0, 0, 1, 1], [], []>} : vector<1x32xf32>, vector<32x32xf32>, vector<1x32xf32> -> vector<1x32xf32>
      %c0_102 = arith.constant 0 : index
      %c0_103 = arith.constant 0 : index
      %c0_104 = arith.constant 0 : index
      %237 = vector.load %arg19[%c0_102, %c0_103, %c0_104] : memref<1x1x32xf32, #tpu.memory_space<vmem>>, vector<1x1x32xf32>
      %238 = vector.shape_cast %237 : vector<1x1x32xf32> to vector<1x32xf32>
      %239 = vector.shape_cast %236 : vector<1x32xf32> to vector<1x1x32xf32>
      tpu.vector_store %arg19[%c0_102, %c0_103, %c0_104], %239 {strides = array<i32>} : memref<1x1x32xf32, #tpu.memory_space<vmem>>, vector<1x1x32xf32>,
    } else {
    }
    return
  }
  func.func @transform_0(%arg0: i32, %arg1: i32) -> (i32, i32, i32) {
    %c0_i32 = arith.constant 0 : i32
    %c0_i32_0 = arith.constant 0 : i32
    %c0_i32_1 = arith.constant 0 : i32
    return %arg0, %c0_i32, %c0_i32_0 : i32, i32, i32
  }
  func.func @transform_1(%arg0: i32, %arg1: i32) -> (i32, i32, i32) {
    %c0_i32 = arith.constant 0 : i32
    %c0_i32_0 = arith.constant 0 : i32
    %c0_i32_1 = arith.constant 0 : i32
    return %arg0, %c0_i32, %c0_i32_0 : i32, i32, i32
  }
  func.func @transform_2(%arg0: i32, %arg1: i32) -> (i32, i32, i32) {
    %c0_i32 = arith.constant 0 : i32
    %c0_i32_0 = arith.constant 0 : i32
    %c0_i32_1 = arith.constant 0 : i32
    return %arg1, %c0_i32, %c0_i32_0 : i32, i32, i32
  }
  func.func @transform_3(%arg0: i32, %arg1: i32) -> (i32, i32, i32) {
    %c0_i32 = arith.constant 0 : i32
    %c0_i32_0 = arith.constant 0 : i32
    %c0_i32_1 = arith.constant 0 : i32
    return %arg1, %c0_i32, %c0_i32_0 : i32, i32, i32
  }
  func.func @transform_4(%arg0: i32, %arg1: i32) -> (i32, i32, i32) {
    %c0_i32 = arith.constant 0 : i32
    %c0_i32_0 = arith.constant 0 : i32
    %c0_i32_1 = arith.constant 0 : i32
    return %arg1, %c0_i32, %c0_i32_0 : i32, i32, i32
  }
  func.func @transform_5(%arg0: i32, %arg1: i32) -> (i32, i32, i32) {
    %c0_i32 = arith.constant 0 : i32
    %c0_i32_0 = arith.constant 0 : i32
    %c0_i32_1 = arith.constant 0 : i32
    return %arg1, %c0_i32, %c0_i32_0 : i32, i32, i32
  }
  func.func @transform_6(%arg0: i32, %arg1: i32) -> (i32, i32, i32) {
    %c0_i32 = arith.constant 0 : i32
    %c0_i32_0 = arith.constant 0 : i32
    %c0_i32_1 = arith.constant 0 : i32
    return %arg1, %c0_i32, %c0_i32_0 : i32, i32, i32
  }
  func.func @transform_7(%arg0: i32, %arg1: i32) -> (i32, i32, i32) {
    %c0_i32 = arith.constant 0 : i32
    %c0_i32_0 = arith.constant 0 : i32
    %c0_i32_1 = arith.constant 0 : i32
    return %arg1, %c0_i32, %c0_i32_0 : i32, i32, i32
  }
  func.func @transform_8(%arg0: i32, %arg1: i32) -> (i32, i32, i32) {
    %c0_i32 = arith.constant 0 : i32
    %c0_i32_0 = arith.constant 0 : i32
    %c0_i32_1 = arith.constant 0 : i32
    return %arg1, %c0_i32, %c0_i32_0 : i32, i32, i32
  }
  func.func @transform_9(%arg0: i32, %arg1: i32) -> (i32, i32, i32) {
    %c0_i32 = arith.constant 0 : i32
    %c0_i32_0 = arith.constant 0 : i32
    %c0_i32_1 = arith.constant 0 : i32
    return %arg1, %c0_i32, %c0_i32_0 : i32, i32, i32
  }
  func.func @transform_10(%arg0: i32, %arg1: i32) -> (i32, i32, i32) {
    %c0_i32 = arith.constant 0 : i32
    %c0_i32_0 = arith.constant 0 : i32
    %c0_i32_1 = arith.constant 0 : i32
    return %arg1, %c0_i32, %c0_i32_0 : i32, i32, i32
  }
  func.func @transform_11(%arg0: i32, %arg1: i32) -> (i32, i32, i32) {
    %c0_i32 = arith.constant 0 : i32
    %c0_i32_0 = arith.constant 0 : i32
    %c0_i32_1 = arith.constant 0 : i32
    return %arg1, %c0_i32, %c0_i32_0 : i32, i32, i32
  }
  func.func @transform_12(%arg0: i32, %arg1: i32) -> (i32, i32, i32) {
    %c0_i32 = arith.constant 0 : i32
    %c0_i32_0 = arith.constant 0 : i32
    %c0_i32_1 = arith.constant 0 : i32
    return %arg1, %c0_i32, %c0_i32_0 : i32, i32, i32
  }
  func.func @transform_13(%arg0: i32, %arg1: i32) -> (i32, i32, i32) {
    %c0_i32 = arith.constant 0 : i32
    %c0_i32_0 = arith.constant 0 : i32
    %c0_i32_1 = arith.constant 0 : i32
    return %arg1, %c0_i32, %c0_i32_0 : i32, i32, i32
  }
  func.func @transform_14(%arg0: i32, %arg1: i32) -> (i32, i32) {
    %c0_i32 = arith.constant 0 : i32
    %c0_i32_0 = arith.constant 0 : i32
    %c0_i32_1 = arith.constant 0 : i32
    return %c0_i32, %c0_i32_0 : i32, i32
  }
  func.func @transform_15(%arg0: i32, %arg1: i32) -> (i32, i32) {
    %c0_i32 = arith.constant 0 : i32
    %c0_i32_0 = arith.constant 0 : i32
    %c0_i32_1 = arith.constant 0 : i32
    return %c0_i32, %c0_i32_0 : i32, i32
  }
  func.func @transform_16(%arg0: i32, %arg1: i32) -> (i32, i32) {
    %c0_i32 = arith.constant 0 : i32
    %c0_i32_0 = arith.constant 0 : i32
    %c0_i32_1 = arith.constant 0 : i32
    return %c0_i32, %c0_i32_0 : i32, i32
  }
  func.func @transform_17(%arg0: i32, %arg1: i32) -> (i32, i32, i32) {
    %c0_i32 = arith.constant 0 : i32
    %c0_i32_0 = arith.constant 0 : i32
    %c0_i32_1 = arith.constant 0 : i32
    return %arg0, %c0_i32, %c0_i32_0 : i32, i32, i32
  }
}

</mosaic_0001>

<bundles_post_ra>
// kernel: clip_motion_align_forward.2
= control target key start
LH: loop header
LB: loop body
LE: loop exit
PB: predicated region body
PF: predicated region fallthrough
CT: control target
= control target key end

     0   :  { %11 = vsyncpa [#allocation3], 0  ;;  %s429_s0 = inlined_call_operand.vmem [shape: f32[32,8], index: 0, kind: input, shape index: {}]   ;;  %s430_s1 = inlined_call_operand.vmem [shape: f32[8,32], index: 1, kind: input, shape index: {}]   ;;  %s431_s2 = inlined_call_operand.vmem [shape: f32[1,32], index: 2, kind: input, shape index: {}]   ;;  %s432_s3 = inlined_call_operand.hbm [shape: f32[32,32], index: 3, kind: input, shape index: {}]   ;;  %s433_s4 = inlined_call_operand.vmem [shape: f32[1,32], index: 4, kind: input, shape index: {}]   ;;  %s434_s5 = inlined_call_operand.vmem [shape: s32[2,1], index: 5, kind: input, shape index: {}]   ;;  %s435_s6 = inlined_call_operand.hbm [shape: f32[2,32], index: 6, kind: output, shape index: {}]  }
   0x1   :  { %12 = vsyncpa [#allocation4], 0  ;;  %s23_s23 = sshll.u32 %s432_s3, 4  ;;  %s347_s24 = smov [#allocation2]   ;;  %s24_s23 = int_to_ptr.hbm [resolvable:$true] %s23_s23 }
   0x2   :  { %s25_s25 = sshll.u32 %s347_s24, 4  ;;  %s348_s26 = smov 128   ;;  %s26_s25 = int_to_ptr.vmem [resolvable:$true] %s25_s25 }
   0x3   :  { %s349_s27 = smov 8  }
   0x4   :  { %31 = dma.hbm_to_vmem [thread:$0]  %s24_s23, 512, %s26_s25, [#allocation3], %s348_s26, %s348_s26, %s349_s27  }
   0x5   :  { %343 = dma.done.wait [#allocation3], 512  }
   0x6   :  { %344 = vsyncadd [#allocation3], 4294966784  ;;  %vm49_vm0 = vcmask 64512   ;;  %v44_v0 = vld [vmem:[%s430_s1] sm:$0xff]  ;;  %v43_v2 = vld [vmem:[%s429_s0 + $0x18] sm:$0xff]  ;;  %v350_v23 = vmov 0   ;;  %v178_v60 = vlaneseq }
   0x7   :  { %v40_v1 = vld [vmem:[%s429_s0] sm:$0xff]  ;;  %77 = vmatpush.msra.mxu0 %v44_v0  ;;  %271 = vmatpush.msra.mxu2 %v44_v0  ;;  %v41_v3 = vld [vmem:[%s429_s0 + $0x8] sm:$0xff]  ;;  %v42_v4 = vld [vmem:[%s429_s0 + $0x10] sm:$0xff]  ;;  %vm135_vm3 = vcmask 261120   ;;  %s251_s18 = sshll.u32 %s435_s6, 4  ;;  %vm242_vm13 = vcmask 254976   ;;  %s252_s18 = int_to_ptr.hbm [resolvable:$true] %s251_s18 }
   0x8   :  { %261 = vmatmul.msk.f32.vlgmr.msra.gmra.mxu0 %vm49_vm0, %v40_v1  ;;  %264 = vmatmul.msk.f32.vlgmr.msra.gmra.mxu2 %vm49_vm0, %v43_v2  ;;  %v130_v5 = vld [vmem:[#allocation2 + $0x18] sm:$0xff]  ;;  %v129_v6 = vld [vmem:[#allocation2 + $0x10] sm:$0xff]  ;;  %v128_v7 = vld [vmem:[#allocation2 + $0x8] sm:$0xff]  ;;  %v179_v62 = vshrl.u32 %v178_v60, 7  ;;  %v181_v0 = vand.u32 127, %v178_v60 }
   0x9   :  { %160 = vmatpush.msra.mxu1 %v130_v5  ;;  %272 = vmatpush.msra.mxu3 %v130_v5  ;;  %v127_v8 = vld [vmem:[#allocation2] sm:$0xff] }
   0xa   :  { %v283_v9 = vld [vmem:[%s431_s2] ss:$0 sm:$0xff]  ;;  %282 = vset.pattern.permute.xlu0 %v350_v23  ;;  %v182_v1 = vmul.u32 16, %v179_v62 }
   0xb   :  { %161 = vmatpush.msra.mxu1 %v129_v6  ;;  %273 = vmatpush.msra.mxu3 %v129_v6  ;;  %v177_v13 = vld [vmem:[%s434_s5] sm:$0x3] }
   0xc   :  { %vm192_vm1 = vcmp.lt.s32.totalorder %v177_v13, 16 }
   0xd   :  { %162 = vmatpush.msra.mxu1 %v128_v7  ;;  %274 = vmatpush.msra.mxu3 %v128_v7  ;;  %v193_v16 = vsel %vm192_vm1, %v177_v13, 16 }
   0xe   :  { %vm194_vm2 = vcmp.gt.s32.totalorder %v193_v16, 1 }
   0xf   :  { %163 = vmatpush.msra.mxu1 %v127_v8  ;;  %275 = vmatpush.msra.mxu3 %v127_v8  ;;  %v195_v20 = vsel %vm194_vm2, %v193_v16, 1 }
  0x10   :  { %262 = vmatmul.msk.f32.gmra.mxu0 %vm49_vm0, %v41_v3  ;;  %v196_v24 = vcvt.s32.f32 %v195_v20 }
  0x12   :  { %201 = vperm.xlu0 %282, %v196_v24  }
  0x18   :  { %263 = vmatmul.msk.f32.gmra.mxu0 %vm49_vm0, %v42_v4  ;;  %v183_v4 = vsub.s32 %v181_v0, %v182_v1 }
  0x1a   :  { %188 = vperm.xlu0 %282, %v177_v13   ;;  %vm184_vm6 = vcmp.ge.s32.totalorder %v183_v4, 0  ;;  %vm185_vm7 = vcmp.lt.s32.totalorder %v183_v4, 16 }
  0x1b   :  { %vm186_vm9 = vmand %vm184_vm6, %vm185_vm7 }
  0x84   :  { %v202_v59 = vpop.permute.xlu0 %201 }
  0x85   :  { %v79_v10 = vpop.f32.mrf.mxu0  ;;  %vm209_vm4 = vweird.f32 %v202_v59  ;;  %v215_v8 = vand.u32 2147483648, %v202_v59 }
  0x86   :  { %v80_v11 = vadd.f32 %v283_v9, %v79_v10 }
  0x88   :  { %v91_v12 = vmul.f32 %v80_v11, %v80_v11 }
  0x8a   :  { %v95_v14 = vmul.f32 %v91_v12, %v80_v11  ;;  %v284_v12 = vld [vmem:[%s433_s4] ss:$0 sm:$0xff]  ;;  %s352_s4 = smov [#allocation5]  }
  0x8b   :  { %v88_v15 = vpop.f32.mrf.mxu2  ;;  %s249_s15 = sshll.u32 %s352_s4, 4  ;;  %s250_s15 = int_to_ptr.vmem [resolvable:$true] %s249_s15 }
  0x8c   :  { %v99_v17 = vmul.f32 0.044715, %v95_v14  ;;  %v89_v18 = vadd.f32 %v283_v9, %v88_v15  ;;  %v189_v7 = vpop.permute.xlu0 %188  ;;  %v216_v14 = vor.u32 1.1754944e-38, %v215_v8 }
  0x8d   :  { %v82_v19 = vpop.f32.mrf.mxu0  ;;  %vm190_vm10 = vcmp.lt.s32.totalorder %v183_v4, %v189_v7 }
  0x8e   :  { %v103_v21 = vadd.f32 %v99_v17, %v80_v11  ;;  %v83_v22 = vadd.f32 %v283_v9, %v82_v19  ;;  %v94_v25 = vmul.f32 %v89_v18, %v89_v18  ;;  %vm191_vm12 = vmand %vm186_vm9, %vm190_vm10 }
  0x90   :  { %v92_v26 = vmul.f32 %v83_v22, %v83_v22  ;;  %v107_v27 = vmul.f32 0.7978846, %v103_v21  ;;  %v98_v29 = vmul.f32 %v94_v25, %v89_v18  ;;  %v351_v21 = vmov 0.0  }
  0x92   :  { %v96_v28 = vmul.f32 %v92_v26, %v83_v22  ;;  %285 = vtanh.f32 %v107_v27  ;;  %v102_v35 = vmul.f32 0.044715, %v98_v29 }
  0x94   :  { %v100_v30 = vmul.f32 0.044715, %v96_v28  ;;  %v106_v41 = vadd.f32 %v102_v35, %v89_v18 }
  0x95   :  { %v85_v31 = vpop.f32.mrf.mxu0 }
  0x96   :  { %v104_v32 = vadd.f32 %v100_v30, %v83_v22  ;;  %v86_v33 = vadd.f32 %v283_v9, %v85_v31  ;;  %v110_v47 = vmul.f32 0.7978846, %v106_v41 }
  0x98   :  { %v286_v34 = vpop.eup %285  ;;  %v93_v36 = vmul.f32 %v86_v33, %v86_v33  ;;  %v108_v37 = vmul.f32 0.7978846, %v104_v32 }
  0x99   :  { %v115_v38 = vadd.f32 1.0, %v286_v34 }
  0x9a   :  { %v97_v39 = vmul.f32 %v93_v36, %v86_v33  ;;  %287 = vtanh.f32 %v108_v37 }
  0x9b   :  { %v119_v40 = vmul.f32 0.5, %v115_v38 }
  0x9c   :  { %v101_v42 = vmul.f32 0.044715, %v97_v39 }
  0x9d   :  { %v123_v43 = vmul.f32 %v119_v40, %v80_v11  ;;  %v213_v11 = vand.u32 2147483647, %v202_v59 }
  0x9e   :  { %v105_v44 = vadd.f32 %v101_v42, %v86_v33 }
  0x9f   :  { %265 = vmatmul.msk.f32.vlgmr.msra.gmra.mxu1 %vm135_vm3, %v123_v43  ;;  %vm214_vm11 = vcmp.eq.f32.partialorder %v213_v11, 8.507059e+37 }
  0xa0   :  { %v288_v45 = vpop.eup %287  ;;  %v109_v46 = vmul.f32 0.7978846, %v105_v44 }
  0xa1   :  { %v116_v48 = vadd.f32 1.0, %v288_v45 }
  0xa2   :  { %289 = vtanh.f32 %v109_v46 }
  0xa3   :  { %v120_v49 = vmul.f32 0.5, %v116_v48  ;;  %291 = vtanh.f32 %v110_v47 }
  0xa4   :  { %293 = vrcp.f32 %v202_v59 }
  0xa5   :  { %v124_v50 = vmul.f32 %v120_v49, %v83_v22  ;;  %v269_v22 = vsel %vm191_vm12, 1.0, %v351_v21 }
  0xa7   :  { %266 = vmatmul.msk.f32.gmra.mxu1 %vm135_vm3, %v124_v50 }
  0xa8   :  { %v290_v51 = vpop.eup %289 }
  0xa9   :  { %v117_v52 = vadd.f32 1.0, %v290_v51  ;;  %v292_v53 = vpop.eup %291 }
  0xaa   :  { %v118_v56 = vadd.f32 1.0, %v292_v53  ;;  %v294_v61 = vpop.eup %293 }
  0xab   :  { %v121_v54 = vmul.f32 0.5, %v117_v52  ;;  %v205_v63 = vmul.f32 %v294_v61, %v202_v59  ;;  %vm210_vm5 = vweird.f32 %v294_v61 }
  0xac   :  { %v122_v57 = vmul.f32 0.5, %v118_v56  ;;  %vm416_vm8 = vmor %vm209_vm4, %vm210_vm5 }
  0xad   :  { %v125_v55 = vmul.f32 %v121_v54, %v86_v33  ;;  %v206_v2 = vsub.f32 1.0, %v205_v63 }
  0xae   :  { %v126_v58 = vmul.f32 %v122_v57, %v89_v18 }
  0xaf   :  { %267 = vmatmul.msk.f32.vlgmr.msra.gmra.mxu3 %vm135_vm3, %v125_v55  ;;  %v207_v6 = vmul.f32 %v294_v61, %v206_v2 }
  0xb1   :  { %v208_v9 = vadd.f32 %v294_v61, %v207_v6 }
  0xb3   :  { %v212_v17 = vsel %vm416_vm8, %v294_v61, %v208_v9 }
  0xb4   :  { %v217_v20 = vsel %vm214_vm11, %v216_v14, %v212_v17 }
  0xb5   :  { %v218_v24 = vmul.f32 %v269_v22, %v217_v20 }
  0xb7   :  { %268 = vmatmul.msk.f32.gmra.mxu3 %vm135_vm3, %v126_v58 }
 0x11c   :  { %v165_v3 = vpop.f32.mrf.mxu1 }
 0x11d   :  { %v166_v23 = vadd.f32 %v284_v12, %v165_v3 }
 0x124   :  { %v168_v16 = vpop.f32.mrf.mxu1 }
 0x125   :  { %v169_v19 = vadd.f32 %v284_v12, %v168_v16 }
 0x132   :  { %v171_v5 = vpop.f32.mrf.mxu3 }
 0x133   :  { %v172_v18 = vadd.f32 %v284_v12, %v171_v5 }
 0x13a   :  { %v174_v13 = vpop.f32.mrf.mxu3 }
 0x13b   :  { %v175_v15 = vadd.f32 %v284_v12, %v174_v13 }
 0x13d   :  { %234 = vmatpush.msrb.mxu2 %v175_v15 }
 0x13f   :  { %235 = vmatpush.msrb.mxu2 %v172_v18 }
 0x141   :  { %236 = vmatpush.msrb.mxu2 %v169_v19 }
 0x143   :  { %237 = vmatpush.msrb.mxu2 %v166_v23 }
 0x144   :  { %270 = vmatmul.msk.f32.vlgmr.msrb.gmra.mxu2 %vm135_vm3, %v218_v24 }
 0x1c7   :  { %v239_v25 = vpop.f32.mrf.mxu2 }
 0x1c8   :  { %243 = vst.msk [vmem:[#allocation5] sm:$0x3] %vm242_vm13, %v239_v25 }
 0x1c9   :  { %254 = dma.vmem_to_hbm [thread:$0]  %s250_s15, 32, %s252_s18, [#allocation4]  }
 0x1ca   :  { %345 = dma.done.wait [#allocation4], 32  }
 0x1cb   :  { %346 = vsyncadd [#allocation4], 4294967264 }
 0x1cc   :  { %259 = vsyncpa [#allocation3], 1 }
 0x1cd   :  { %260 = vsyncpa [#allocation4], 1 }

// kernel: clip_motion_align_forward.3
= control target key start
LH: loop header
LB: loop body
LE: loop exit
PB: predicated region body
PF: predicated region fallthrough
CT: control target
= control target key end

     0   :  { %s2392_s0 = inlined_call_operand.vmem [shape: f32[2,8,32], index: 0, kind: input, shape index: {}]   ;;  %s2393_s1 = inlined_call_operand.vmem [shape: f32[2,1,8], index: 1, kind: input, shape index: {}]   ;;  %s2394_s2 = inlined_call_operand.vmem [shape: f32[2,1,32], index: 2, kind: input, shape index: {}]   ;;  %s2395_s3 = inlined_call_operand.vmem [shape: f32[2,1,32], index: 3, kind: input, shape index: {}]   ;;  %s2396_s4 = inlined_call_operand.vmem [shape: f32[2,32,96], index: 4, kind: input, shape index: {}]   ;;  %s2397_s5 = inlined_call_operand.vmem [shape: f32[2,1,96], index: 5, kind: input, shape index: {}]   ;;  %s2398_s6 = inlined_call_operand.vmem [shape: f32[2,32,32], index: 6, kind: input, shape index: {}]   ;;  %s2399_s7 = inlined_call_operand.vmem [shape: f32[2,1,32], index: 7, kind: input, shape index: {}]   ;;  %s2400_s8 = inlined_call_operand.vmem [shape: f32[2,1,32], index: 8, kind: input, shape index: {}]   ;;  %s2401_s9 = inlined_call_operand.vmem [shape: f32[2,1,32], index: 9, kind: input, shape index: {}]   ;;  %s2402_s10 = inlined_call_operand.vmem [shape: f32[2,32,128], index: 10, kind: input, shape index: {}]   ;;  %s2403_s11 = inlined_call_operand.vmem [shape: f32[2,1,128], index: 11, kind: input, shape index: {}]   ;;  %s2404_s12 = inlined_call_operand.vmem [shape: f32[2,128,32], index: 12, kind: input, shape index: {}]   ;;  %s2405_s13 = inlined_call_operand.vmem [shape: f32[2,1,32], index: 13, kind: input, shape index: {}]   ;;  %s2406_s14 = inlined_call_operand.vmem [shape: f32[1,32], index: 14, kind: input, shape index: {}]   ;;  %s2407_s15 = inlined_call_operand.vmem [shape: f32[1,32], index: 15, kind: input, shape index: {}]   ;;  %s2408_s16 = inlined_call_operand.vmem [shape: f32[32,32], index: 16, kind: input, shape index: {}]   ;;  %s2409_s17 = inlined_call_operand.hbm [shape: f32[2,1,32], index: 17, kind: output, shape index: {}]  }
   0x1   :  { %2424 = sst [smem:[#allocation18_spill]] %s2392_s0 }
   0x2   :  { %2425 = sst [smem:[#allocation19_spill]] %s2393_s1 }
   0x3   :  { %2426 = sst [smem:[#allocation20_spill]] %s2396_s4 }
   0x4   :  { %2427 = sst [smem:[#allocation21_spill]] %s2398_s6 }
   0x5   :  { %2428 = sst [smem:[#allocation22_spill]] %s2399_s7 }
   0x6   :  { %2429 = sst [smem:[#allocation23_spill]] %s2400_s8 }
   0x7   :  { %2430 = sst [smem:[#allocation24_spill]] %s2403_s11 }
   0x8   :  { %2431 = sst [smem:[#allocation25_spill]] %s2404_s12 }
   0x9   :  { %2432 = sst [smem:[#allocation26_spill]] %s2405_s13 }
   0xa   :  { %2433 = sst [smem:[#allocation27_spill]] %s2406_s14 }
   0xb   :  { %2434 = sst [smem:[#allocation28_spill]] %s2407_s15 }
   0xc   :  { %2435 = sst [smem:[#allocation29_spill]] %s2408_s16 }
   0xd   :  { %2436 = sst [smem:[#allocation30_spill]] %s2409_s17 }
   0xe   :  { %22 = vsyncpa [#allocation4], 0 }
   0xf   :  { %24 = vsyncpa [#allocation4 + $0x1], 0  ;;  %s2028_s24 = smov 0   ;;  %s2030_s25 = smov 0  }
  0x10   :  { %s2032_s26 = smov 0   ;;  %s2034_s27 = smov 0  }
  0x11   :  { %s2036_s28 = smov 0   ;;  %s2038_s29 = smov 0  }
  0x12   :  { %s2040_s0 = smov 0   ;;  %s2042_s30 = smov 0  }
  0x13 LB: > { %2437 = sst [smem:[#allocation6_spill]] %s1893_s24  ;;  %s1658_s18 = sadd.s32 4294967295, %s1921_s30   ;;  %s1921_s30 = sphi %s2042_s30, %s30_s30   ;;  %s1917_s0 = sphi %s2040_s0, %s2490_s0   ;;  %s1913_s29 = sphi %s2038_s29, %s2489_s29   ;;  %s1909_s28 = sphi %s2036_s28, %s2488_s28   ;;  %s1905_s27 = sphi %s2034_s27, %s2487_s27   ;;  %s1901_s26 = sphi %s2032_s26, %s2486_s26   ;;  %s1897_s25 = sphi %s2030_s25, %s2492_s25   ;;  %s1893_s24 = sphi %s2028_s24, %s2491_s24  }
  0x14   : > { %2438 = sst [smem:[#allocation7_spill]] %s1901_s26  ;;  %s1659_s19 = sadd.s32 4294967294, %s1921_s30  }
  0x15   : > { %2439 = sst [smem:[#allocation8_spill]] %s1905_s27  ;;  %s39_s1 = sadd.s32 1, %s1913_s29 }
  0x16   : > { %2440 = sst [smem:[#allocation9_spill]] %s1909_s28  ;;  %p40_p0 = scmp.ge.s32.totalorder %s39_s1, 2 }
  0x17   : > { %2441 = sst [smem:[#allocation10_spill]] %s1913_s29  ;;  %s42_s20 = sadd.s32 1, %s1917_s0 }
  0x18   : > { %2442 = sst [smem:[#allocation11_spill]] %s1917_s0  ;;  %p486_p1 = scmp.ne.s32.totalorder %s1901_s26, %s1897_s25 }
  0x19   : > { %2443 = sst [smem:[#allocation12_spill]] %s1921_s30  ;;  %p487_p2 = scmp.eq.s32.totalorder %s1658_s18, 3 }
  0x1a   : > { %s2494_s1 = smov (%p40_p0, %s39_s1), 0  ;;  %s2496_s20 = smov (!%p40_p0, %s42_s20), %s1917_s0 }
  0x1b   : > { %2444 = sst [smem:[#allocation13_spill]] %s2494_s1  ;;  %p2077_p3 = por %p487_p2, %p486_p1 }
  0x1c   : > { %p492_p4 = scmp.ne.s32.totalorder %s1897_s25, %s1893_s24  ;;  %p44_p5 = scmp.ge.s32.totalorder %s2496_s20, 2 }
  0x1d   : > { %s2445_s21 = scalar_select %p2077_p3, 1, 0 }
  0x1e   : > { %p493_p6 = scmp.eq.s32.totalorder %s1659_s19, 3  ;;  %p1662_p7 = scmp.ge.s32.totalorder %s1921_s30, 1 }
  0x1f   : > { %2446 = sst [smem:[#allocation14_spill]] %s2445_s21  ;;  %p613_p8 = scmp.lt.s32.totalorder %s1921_s30, 5 }
  0x20   : > { %s2498_s20 = smov (%p44_p5, %s2496_s20), 0  ;;  %p2087_p9 = por %p493_p6, %p492_p4 }
  0x21   : > { %2447 = sst [smem:[#allocation15_spill]] %s2498_s20  ;;  %p614_p10 = pnand %p1662_p7, %p613_p8 }
  0x22   : > { %s2448_s22 = scalar_select %p2087_p9, 1, 0 }
  0x23   : > { %s473_s23 = ssub.s32 %s1917_s0, %s2498_s20  ;;  %s476_s18 = sadd.s32 1, %s1901_s26 }
  0x24   : > { %2449 = sst [smem:[#allocation16_spill]] %s2448_s22  ;;  %p474_p11 = scmp.eq.s32.totalorder %s473_s23, 0 }
  0x25   : > { %617 = sbr.rel (%p614_p10) target bundleno = 2782 (0xade), region = 88  ;;  %p710_p12 = scmp.lt.s32.totalorder (!%p614_p10), %s1909_s28, 1 }
  0x26   : > { %s2095_s1 = scalar_select %p474_p11, %s1901_s26, %s476_s18  }
  0x27   : > { %p717_p13 = scmp.lt.s32.totalorder (!%p614_p10), %s1905_s27, 1  ;;  %s2452_s24 = sld [smem:[#allocation18_spill]] (!%p614_p10) }
  0x28   : > { %2450 = sst [smem:[#allocation17_spill]] %s2095_s1  ;;  %s2460_s12 = sand.u32 (!%p614_p10), 1, %s1897_s25  }
  0x29   : > { %s2453_s4 = sld [smem:[#allocation20_spill]] (!%p614_p10)  ;;  %s2170_s13 = scalar_lea.vmem (!%p614_p10), [#allocation3], %s2460_s12 }
  0x2a   : > { %s2101_s29 = scalar_select %p710_p12, %s1909_s28, 1 }
  0x2b   : > { %s2104_s22 = scalar_select %p717_p13, %s1905_s27, 1 }
  0x2c   : > { %s1663_s23 = sshll.u32 %s2101_s29, 3  ;;  %s2454_s6 = sld [smem:[#allocation21_spill]] }
  0x2d   : > { %s713_s30 = scalar_lea.vmem %s2452_s24, %s1663_s23  ;;  %s1699_s27 = sshll.u32 %s2104_s22, 5 }
  0x2e   : > { %s744_s16 = scalar_lea.vmem %s2401_s9, %s2104_s22  ;;  %s2152_s19 = scalar_lea.vmem %s2402_s10, %s1699_s27 }
  0x2f   : > { %s2126_s11 = scalar_lea.vmem %s2453_s4, %s1699_s27  ;;  %s2457_s26 = sld [smem:[#allocation24_spill]] }
  0x30   : > { %s2458_s14 = sld [smem:[#allocation26_spill]] }
  0x31   : > { %s2459_s0 = sld [smem:[#allocation25_spill]] }
  0x32   : > { %s2135_s23 = scalar_lea.vmem %s2454_s6, %s1699_s27  ;;  %s1702_s6 = sshll.u32 %s2104_s22, 7 }
  0x33   : > { %s2461_s28 = sld [smem:[#allocation8_spill]] }
  0x35   : > { %s752_s4 = scalar_lea.vmem %s2457_s26, %s2104_s22 }
  0x36   : > { %s760_s7 = scalar_lea.vmem %s2458_s14, %s2104_s22 }
  0x37   : > { %s2166_s8 = scalar_lea.vmem %s2459_s0, %s1702_s6 }
  0x39   : > { %p1672_p0 = scmp.ne.s32.totalorder %s2461_s28, 0 }
  0x3b   : > { %764 = sbr.rel (%p1672_p0) target bundleno = 66 (0x42), region = 92 }
  0x40   : > { %v765_v0 = vld [vmem:[%s713_s30] sm:$0xff]  ;;  %vm766_vm0 = vcmask 261120  }
  0x41   : > { %767 = vst.msk [vmem:[#allocation2] sm:$0xff] %vm766_vm0, %v765_v0 }
  0x42 PF: > { %vm772_vm1 = vcmask 261120   ;;  %v1923_v3 = vmov 32.0   ;;  %v813_v15 = vld [vmem:[%s2126_s11 + $0x18] sm:$0xff]  ;;  %v812_v16 = vld [vmem:[%s2126_s11 + $0x10] sm:$0xff]  ;;  %v811_v17 = vld [vmem:[%s2126_s11 + $0x8] sm:$0xff]  ;;  %s2462_s27 = scalar_lea.vmem %s2394_s2, %s2104_s22  ;;  %s2463_s26 = scalar_lea.vmem %s2395_s3, %s2104_s22  ;;  %vm859_vm6 = vcmask 64512   ;;  %v841_v43 = vlaneseq }
  0x43   : > { %1797 = vrcp.f32 %v1923_v3  ;;  %833 = vmatpush.msra.mxu0 %v813_v15  ;;  %v810_v18 = vld [vmem:[%s2126_s11] sm:$0xff]  ;;  %s2464_s1 = scalar_lea.vmem %s2397_s5, %s2104_s22  ;;  %s1924_s24 = smov 112   ;;  %v1929_v44 = vmov 0   ;;  %v1930_v50 = vmov -1e+09  }
  0x44   : > { %v1789_v28 = vld [vmem:[%s2462_s27] ss:$0 sm:$0xff]  ;;  %s1925_s17 = smov 120   ;;  %s1926_s21 = smov 96   ;;  %v842_v46 = vshrl.u32 %v841_v43, 7  ;;  %v2225_v47 = vand.u32 127, %v841_v43 }
  0x45   : > { %834 = vmatpush.msra.mxu0 %v812_v16  ;;  %v1790_v31 = vld [vmem:[%s2463_s26] ss:$0 sm:$0xff]  ;;  %s1927_s15 = smov 80   ;;  %s1928_s18 = smov 88  }
  0x46   : > { %v1791_v34 = vld [vmem:[%s2464_s1] ss:$0 sm:$0xff]  ;;  %s2465_s6 = sld [smem:[#allocation19_spill]]  ;;  %vm845_vm8 = vcmp.le.s32.totalorder %v2225_v47, %v842_v46  ;;  %s1932_s27 = smov 48  }
  0x47   : > { %835 = vmatpush.msra.mxu0 %v811_v17  ;;  %s1933_s0 = smov 72   ;;  %s1934_s30 = smov 104  }
  0x48   : > { %v2173_v1 = vld [vmem:[#allocation2] sm:$0xff]  ;;  %s1935_s26 = smov 40   ;;  %s1936_s14 = smov 56  }
  0x49   : > { %v773_v2 = vsel %vm772_vm1, %v2173_v1, 0.0  ;;  %v1798_v4 = vpop.eup %1797  ;;  %836 = vmatpush.msra.mxu0 %v810_v18 }
  0x4a   : > { %774 = vadd.xlane.f32.xlu0 %v773_v2  ;;  %v777_v5 = vmul.f32 32.0, %v1798_v4  ;;  %vm781_vm2 = vweird.f32 %v1798_v4 }
  0x4c   : > { %v778_v6 = vsub.f32 1.0, %v777_v5  ;;  %s2466_s11 = scalar_lea.vmem %s2465_s6, %s2101_s29  ;;  %s1931_s29 = smov 64  }
  0x4d   : > { %v2222_v42 = vld [vmem:[%s2466_s11] sm:$0x1] }
  0x4e   : > { %v779_v7 = vmul.f32 %v1798_v4, %v778_v6  ;;  %vm846_vm7 = vcmp.gt.f32.partialorder %v2222_v42, 0.5 }
  0x4f   : > { %v847_v45 = vsel %vm846_vm7, 1, %v1929_v44 }
  0x50   : > { %v780_v8 = vadd.f32 %v1798_v4, %v779_v7  ;;  %v848_v48 = vperm.slane %v847_v45, 0 }
  0x52   : > { %v2177_v9 = vsel %vm781_vm2, %v1798_v4, %v780_v8  ;;  %vm849_vm9 = vcmp.eq.s32.totalorder %v848_v48, 1 }
  0x53   : > { %vm850_vm10 = vmand %vm845_vm8, %vm849_vm9 }
  0x54   : > { %v2228_v51 = vsel %vm850_vm10, 0.0, %v1930_v50 }
  0xbd   : > { %v775_v10 = vpop.xlane.xlu0 %774 }
  0xbe   : > { %v783_v11 = vmul.f32 %v2177_v9, %v775_v10 }
  0xc0   : > { %v784_v12 = vsub.f32 %v2173_v1, %v783_v11 }
  0xc2   : > { %v785_v13 = vmul.f32 %v784_v12, %v784_v12 }
  0xc4   : > { %v786_v14 = vsel %vm772_vm1, %v785_v13, 0.0 }
  0xc5   : > { %787 = vadd.xlane.f32.xlu0 %v786_v14 }
 0x138   : > { %v788_v19 = vpop.xlane.xlu0 %787 }
 0x139   : > { %v789_v20 = vmul.f32 %v788_v19, %v2177_v9 }
 0x13b   : > { %v790_v21 = vadd.f32 1e-05, %v789_v20 }
 0x13d   : > { %1799 = vrsqrt.f32 %v790_v21  ;;  %vm797_vm4 = vweird.f32 %v790_v21 }
 0x143   : > { %v1800_v22 = vpop.eup %1799 }
 0x144   : > { %v792_v23 = vmul.f32 %v1800_v22, %v790_v21  ;;  %vm798_vm3 = vweird.f32 %v1800_v22 }
 0x145   : > { %vm799_vm5 = vmor %vm797_vm4, %vm798_vm3 }
 0x146   : > { %v793_v24 = vmul.f32 %v1800_v22, %v792_v23 }
 0x148   : > { %v794_v25 = vmul.f32 0.5, %v793_v24 }
 0x14a   : > { %v795_v26 = vsub.f32 1.5, %v794_v25 }
 0x14c   : > { %v796_v27 = vmul.f32 %v1800_v22, %v795_v26 }
 0x14e   : > { %v800_v29 = vsel %vm799_vm5, %v1800_v22, %v796_v27 }
 0x14f   : > { %v801_v30 = vmul.f32 %v800_v29, %v784_v12 }
 0x151   : > { %v805_v32 = vmul.f32 %v1789_v28, %v801_v30 }
 0x153   : > { %v809_v33 = vadd.f32 %v1790_v31, %v805_v32  ;;  %v852_v31 = vld [vmem:[%s2135_s23] sm:$0xff] }
 0x154   : > { %1031 = vmatpush.msra.mxu3 %v852_v31  ;;  %v1317_v31 = vld [vmem:[%s2166_s8 + $0x48] sm:$0xff] }
 0x155   : > { %1673 = vmatmul.msk.f32.vlgmr.msra.gmra.mxu0 %vm772_vm1, %v809_v33  ;;  %v853_v33 = vld [vmem:[%s2135_s23 + $0x8] sm:$0xff] }
 0x1d2   : > { %v838_v35 = vpop.f32.mrf.mxu0 }
 0x1d3   : > { %v2203_v36 = vadd.f32 %v1791_v34, %v838_v35  ;;  %v854_v34 = vld [vmem:[%s2135_s23 + $0x10] sm:$0xff] }
 0x1d5   : > { %1036 = vrot.lane.b32.xlu0 %v2203_v36, %s1924_s24  ;;  %923 = vrot.lane.b32.xlu2 %v2203_v36, %s1925_s17  ;;  %s2467_s24 = sld [smem:[#allocation22_spill]] }
 0x1d6   : > { %857 = vrot.lane.b32.xlu1 %v2203_v36, %s1926_s21  ;;  %s2469_s21 = sld [smem:[#allocation23_spill]] }
 0x1db   : > { %s2468_s17 = scalar_lea.vmem %s2467_s24, %s2104_s22 }
 0x1dd   : > { %1038 = vrot.lane.b32.xlu2 %v2203_v36, %s1927_s15  ;;  %s2470_s15 = scalar_lea.vmem %s2469_s21, %s2104_s22 }
 0x1de   : > { %925 = vrot.lane.b32.xlu1 %v2203_v36, %s1928_s18 }
 0x22f   : > { %v924_v37 = vpop.permute.xlu2 %923 }
 0x237   : > { %v1039_v40 = vpop.permute.xlu2 %1038 }
 0x247   : > { %v1037_v41 = vpop.permute.xlu0 %1036 }
 0x248   : > { %v858_v38 = vpop.permute.xlu1 %857 }
 0x249   : > { %1674 = vmatpush.xpose.msk.msra.mxu1 %vm859_vm6, %v858_v38 }
 0x24c   : > { %1675 = vmatmul.msk.f32.vlgmr.msra.gmra.mxu1 %vm859_vm6, %v2203_v36 }
 0x24d   : > { %1008 = vmatpush.msrb.mxu1 %v853_v33  ;;  %v1315_v33 = vld [vmem:[%s2166_s8 + $0x38] sm:$0xff] }
 0x24f   : > { %1121 = vmatpush.msra.mxu1 %v854_v34  ;;  %v1314_v34 = vld [vmem:[%s2166_s8 + $0x30] sm:$0xff] }
 0x250   : > { %v926_v39 = vpop.permute.xlu1 %925 }
 0x251   : > { %1677 = vmatpush.xpose.msk.msrb.mxu0 %vm859_vm6, %v926_v39 }
 0x254   : > { %1678 = vmatmul.msk.f32.vlgmr.msrb.gmra.mxu0 %vm859_vm6, %v924_v37 }
 0x255   : > { %1682 = vmatpush.xpose.msk.msra.mxu0 %vm859_vm6, %v1039_v40 }
 0x25c   : > { %1683 = vmatmul.msk.f32.vlgmr.msra.gmra.mxu0 %vm859_vm6, %v1037_v41 }
 0x2c9   : > { %v881_v49 = vpop.f32.mrf.mxu1 }
 0x2ca   : > { %v884_v52 = vmul.f32 0.35355338, %v881_v49 }
 0x2cc   : > { %v885_v53 = vadd.f32 %v884_v52, %v2228_v51  ;;  %v855_v52 = vld [vmem:[%s2135_s23 + $0x18] sm:$0xff] }
 0x2ce   : > { %v886_v54 = vsel %vm859_vm6, %v885_v53, -inf }
 0x2cf   : > { %887 = vmax.xlane.f32.xlu1 %v886_v54 }
 0x2d1   : > { %v948_v55 = vpop.f32.mrf.mxu0 }
 0x2d2   : > { %v951_v56 = vmul.f32 0.35355338, %v948_v55 }
 0x2d4   : > { %v952_v57 = vadd.f32 %v951_v56, %v2228_v51 }
 0x2d6   : > { %v953_v58 = vsel %vm859_vm6, %v952_v57, -inf }
 0x2d7   : > { %954 = vmax.xlane.f32.xlu2 %v953_v58 }
 0x2d9   : > { %v1061_v59 = vpop.f32.mrf.mxu0 }
 0x2da   : > { %v1064_v60 = vmul.f32 0.35355338, %v1061_v59 }
 0x2dc   : > { %v1065_v61 = vadd.f32 %v1064_v60, %v2228_v51  ;;  %v1792_v60 = vld [vmem:[%s2468_s17] ss:$0 sm:$0xff] }
 0x2de   : > { %v1066_v62 = vsel %vm859_vm6, %v1065_v61, -inf }
 0x2df   : > { %1067 = vmax.xlane.f32.xlu0 %v1066_v62 }
 0x2ef   : > { %897 = vrot.lane.b32.xlu2 %v2203_v36, %s1931_s29  ;;  %s2473_s29 = sld [smem:[#allocation8_spill]] }
 0x2f3   : > { %1077 = vrot.lane.b32.xlu0 %v2203_v36, %s1932_s27 }
 0x2f5   : > { %p1692_p1 = scmp.ne.s32.totalorder %s2473_s29, 1 }
 0x2f6   : > { %s2474_s27 = sld [smem:[#allocation29_spill]] (!%p1692_p1) }
 0x2f7   : > { %s2476_s17 = sld [smem:[#allocation27_spill]] (!%p1692_p1) }
 0x2f8   : > { %s2477_s21 = sld [smem:[#allocation28_spill]] (!%p1692_p1) }
 0x342   : > { %v888_v63 = vpop.xlane.xlu1 %887 }
 0x343   : > { %v889_v0 = vsub.f32 %v885_v53, %v888_v63 }
 0x345   : > { %v890_v2 = vmul.f32 1.442695, %v889_v0 }
 0x347   : > { %1801 = vpow2.f32 %v890_v2 }
 0x34a   : > { %v955_v3 = vpop.xlane.xlu2 %954 }
 0x34b   : > { %v956_v4 = vsub.f32 %v952_v57, %v955_v3 }
 0x34d   : > { %v1802_v5 = vpop.eup %1801  ;;  %v957_v6 = vmul.f32 1.442695, %v956_v4 }
 0x34e   : > { %v892_v7 = vsel %vm859_vm6, %v1802_v5, 0.0 }
 0x34f   : > { %1803 = vpow2.f32 %v957_v6  ;;  %893 = vadd.xlane.f32.xlu2 %v892_v7  ;;  %v1259_v6 = vld [vmem:[%s2152_s19 + $0x18] sm:$0xff]  ;;  %v1258_v7 = vld [vmem:[%s2152_s19 + $0x10] sm:$0xff] }
 0x352   : > { %v1068_v8 = vpop.xlane.xlu0 %1067  ;;  %v898_v10 = vpop.permute.xlu2 %897 }
 0x353   : > { %v1069_v11 = vsub.f32 %v1065_v61, %v1068_v8  ;;  %918 = vmatpush.msra.mxu2 %v898_v10  ;;  %v1256_v8 = vld [vmem:[%s2152_s19] sm:$0xff] }
 0x355   : > { %v1804_v12 = vpop.eup %1803  ;;  %v1070_v13 = vmul.f32 1.442695, %v1069_v11 }
 0x356   : > { %v959_v14 = vsel %vm859_vm6, %v1804_v12, 0.0 }
 0x357   : > { %1805 = vpow2.f32 %v1070_v13  ;;  %960 = vadd.xlane.f32.xlu1 %v959_v14 }
 0x35d   : > { %v1806_v15 = vpop.eup %1805 }
 0x35e   : > { %v1072_v16 = vsel %vm859_vm6, %v1806_v15, 0.0 }
 0x35f   : > { %1073 = vadd.xlane.f32.xlu1 %v1072_v16 }
 0x365   : > { %v1078_v28 = vpop.permute.xlu0 %1077 }
 0x367   : > { %1129 = vrot.lane.b32.xlu2 %v2203_v36, %s1933_s0 }
 0x36f   : > { %1127 = vrot.lane.b32.xlu2 %v2203_v36, %s1934_s30 }
 0x377   : > { %1168 = vrot.lane.b32.xlu2 %v2203_v36, %s1935_s26 }
 0x378   : > { %964 = vrot.lane.b32.xlu1 %v2203_v36, %s1936_s14  ;;  %s2475_s14 = smov (!%p1692_p1), %s2474_s27 }
 0x3c2   : > { %v894_v17 = vpop.xlane.xlu2 %893 }
 0x3c3   : > { %1807 = vrcp.f32 %v894_v17 }
 0x3c9   : > { %v1808_v18 = vpop.eup %1807 }
 0x3ca   : > { %v1130_v19 = vpop.permute.xlu2 %1129  ;;  %v896_v20 = vmul.f32 %v1808_v18, %v1802_v5  ;;  %v961_v22 = vpop.xlane.xlu1 %960 }
 0x3cb   : > { %1809 = vrcp.f32 %v961_v22  ;;  %v1794_v22 = vld [vmem:[%s744_s16] ss:$0 sm:$0xff] }
 0x3cc   : > { %1676 = vmatmul.msk.f32.vlgmr.msra.gmra.mxu2 %vm859_vm6, %v896_v20 }
 0x3d1   : > { %v1810_v25 = vpop.eup %1809 }
 0x3d2   : > { %v1128_v21 = vpop.permute.xlu2 %1127  ;;  %v1074_v24 = vpop.xlane.xlu1 %1073  ;;  %v963_v27 = vmul.f32 %v1810_v25, %v1804_v12  ;;  %v1323_v25 = vld [vmem:[%s2166_s8 + $0x78] sm:$0xff] }
 0x3d3   : > { %1811 = vrcp.f32 %v1074_v24  ;;  %1324 = vmatpush.msrb.mxu3 %v1323_v25 }
 0x3d9   : > { %v1812_v29 = vpop.eup %1811 }
 0x3da   : > { %v1169_v23 = vpop.permute.xlu2 %1168  ;;  %v1076_v30 = vmul.f32 %v1812_v29, %v1806_v15  ;;  %v1319_v29 = vld [vmem:[%s2166_s8 + $0x58] sm:$0xff] }
 0x3db   : > { %1189 = vmatpush.msrb.mxu0 %v1169_v23 }
 0x3ea   : > { %v965_v26 = vpop.permute.xlu1 %964 }
 0x3eb   : > { %985 = vmatpush.msrb.mxu2 %v965_v26  ;;  %v1322_v26 = vld [vmem:[%s2166_s8 + $0x70] sm:$0xff] }
 0x3ec   : > { %1679 = vmatmul.msk.f32.vlgmr.msrb.gmra.mxu2 %vm859_vm6, %v963_v27  ;;  %1325 = vmatpush.msrb.mxu3 %v1322_v26  ;;  %v1321_v27 = vld [vmem:[%s2166_s8 + $0x68] sm:$0xff] }
 0x3ed   : > { %1098 = vmatpush.msra.mxu2 %v1078_v28  ;;  %v1320_v28 = vld [vmem:[%s2166_s8 + $0x60] sm:$0xff] }
 0x3ee   : > { %1326 = vmatpush.msrb.mxu3 %v1321_v27 }
 0x3ef   : > { %1686 = vmatpush.xpose.msk.msrb.mxu2 %vm859_vm6, %v1130_v19  ;;  %v1793_v19 = vld [vmem:[%s2470_s15] ss:$0 sm:$0xff] }
 0x3f0   : > { %1327 = vmatpush.msrb.mxu3 %v1320_v28 }
 0x3f2   : > { %1328 = vmatpush.msrb.mxu3 %v1319_v29 }
 0x3f4   : > { %1684 = vmatmul.msk.f32.vlgmr.msra.gmra.mxu2 %vm859_vm6, %v1076_v30  ;;  %v1318_v30 = vld [vmem:[%s2166_s8 + $0x50] sm:$0xff] }
 0x3f5   : > { %1212 = vmatpush.msra.mxu2 %v855_v52  ;;  %1329 = vmatpush.msrb.mxu3 %v1318_v30 }
 0x3f7   : > { %1330 = vmatpush.msrb.mxu3 %v1317_v31 }
 0x3fc   : > { %1687 = vmatmul.msk.f32.vlgmr.msrb.gmra.mxu2 %vm859_vm6, %v1128_v21 }
 0x44f   : > { %v920_v32 = vpop.f32.mrf.mxu2 }
 0x450   : > { %1681 = vmatmul.msk.f32.vlgmr.msra.gmra.mxu3 %vm859_vm6, %v920_v32  ;;  %v1316_v32 = vld [vmem:[%s2166_s8 + $0x40] sm:$0xff] }
 0x451   : > { %1331 = vmatpush.msrb.mxu3 %v1316_v32 }
 0x453   : > { %1332 = vmatpush.msrb.mxu3 %v1315_v33 }
 0x455   : > { %1333 = vmatpush.msrb.mxu3 %v1314_v34 }
 0x46f   : > { %v987_v35 = vpop.f32.mrf.mxu2 }
 0x470   : > { %1680 = vmatmul.msk.f32.vlgmr.msrb.gmra.mxu1 %vm859_vm6, %v987_v35  ;;  %v1313_v35 = vld [vmem:[%s2166_s8 + $0x28] sm:$0xff] }
 0x471   : > { %1279 = vmatpush.msrb.mxu1 %v1259_v6  ;;  %1334 = vmatpush.msrb.mxu3 %v1313_v35 }
 0x473   : > { %1280 = vmatpush.msrb.mxu1 %v1258_v7 }
 0x477   : > { %v1100_v36 = vpop.f32.mrf.mxu2 }
 0x478   : > { %1685 = vmatmul.msk.f32.vlgmr.msra.gmra.mxu1 %vm859_vm6, %v1100_v36  ;;  %v1312_v36 = vld [vmem:[%s2166_s8 + $0x20] sm:$0xff] }
 0x479   : > { %1335 = vmatpush.msrb.mxu3 %v1312_v36 }
 0x47f   : > { %v1152_v37 = vpop.f32.mrf.mxu2 }
 0x480   : > { %v1155_v38 = vmul.f32 0.35355338, %v1152_v37  ;;  %v1311_v37 = vld [vmem:[%s2166_s8 + $0x18] sm:$0xff] }
 0x481   : > { %1336 = vmatpush.msrb.mxu3 %v1311_v37 }
 0x482   : > { %v1156_v39 = vadd.f32 %v1155_v38, %v2228_v51  ;;  %v1795_v38 = vld [vmem:[%s752_s4] ss:$0 sm:$0xff] }
 0x484   : > { %v1157_v40 = vsel %vm859_vm6, %v1156_v39, -inf }
 0x485   : > { %1158 = vmax.xlane.f32.xlu0 %v1157_v40 }
 0x4d3   : > { %v1033_v54 = vpop.f32.mrf.mxu3 }
 0x4ed   : > { %v1010_v53 = vpop.f32.mrf.mxu1 }
 0x4ee   : > { %v1034_v56 = vadd.f32 %v1033_v54, %v1010_v53 }
 0x4f5   : > { %v1123_v55 = vpop.f32.mrf.mxu1 }
 0x4f6   : > { %v1126_v57 = vadd.f32 %v1123_v55, %v1034_v56 }
 0x4f8   : > { %v1159_v41 = vpop.xlane.xlu0 %1158 }
 0x4f9   : > { %v1160_v43 = vsub.f32 %v1156_v39, %v1159_v41  ;;  %v1310_v39 = vld [vmem:[%s2166_s8 + $0x10] sm:$0xff]  ;;  %v1309_v41 = vld [vmem:[%s2166_s8 + $0x8] sm:$0xff] }
 0x4fa   : > { %1337 = vmatpush.msrb.mxu3 %v1310_v39 }
 0x4fb   : > { %v1161_v44 = vmul.f32 1.442695, %v1160_v43 }
 0x4fc   : > { %1338 = vmatpush.msrb.mxu3 %v1309_v41 }
 0x4fd   : > { %1813 = vpow2.f32 %v1161_v44  ;;  %v1308_v44 = vld [vmem:[%s2166_s8] sm:$0xff] }
 0x4fe   : > { %1339 = vmatpush.msrb.mxu3 %v1308_v44 }
 0x503   : > { %v1814_v45 = vpop.eup %1813 }
 0x504   : > { %v1163_v46 = vsel %vm859_vm6, %v1814_v45, 0.0 }
 0x505   : > { %1164 = vadd.xlane.f32.xlu1 %v1163_v46 }
 0x578   : > { %v1165_v48 = vpop.xlane.xlu1 %1164 }
 0x579   : > { %1815 = vrcp.f32 %v1165_v48 }
 0x57f   : > { %v1816_v49 = vpop.eup %1815 }
 0x580   : > { %v1167_v50 = vmul.f32 %v1816_v49, %v1814_v45 }
 0x582   : > { %1688 = vmatmul.msk.f32.vlgmr.msrb.gmra.mxu0 %vm859_vm6, %v1167_v50 }
 0x5ff   : > { %v1191_v51 = vpop.f32.mrf.mxu0 }
 0x600   : > { %1689 = vmatmul.msk.f32.vlgmr.msra.gmra.mxu2 %vm859_vm6, %v1191_v51 }
 0x683   : > { %v1214_v58 = vpop.f32.mrf.mxu2 }
 0x684   : > { %v1217_v59 = vadd.f32 %v1214_v58, %v1126_v57 }
 0x686   : > { %v1218_v61 = vadd.f32 %v1217_v59, %v2173_v1  ;;  %v1257_v1 = vld [vmem:[%s2152_s19 + $0x8] sm:$0xff] }
 0x687   : > { %1281 = vmatpush.msrb.mxu1 %v1257_v1 }
 0x688   : > { %v2268_v62 = vadd.f32 %v1792_v60, %v1218_v61  ;;  %v1796_v61 = vld [vmem:[%s760_s7] ss:$0 sm:$0xff] }
 0x689   : > { %1282 = vmatpush.msrb.mxu1 %v1256_v8 }
 0x68a   : > { %v1226_v63 = vsel %vm772_vm1, %v2268_v62, 0.0 }
 0x68b   : > { %1227 = vadd.xlane.f32.xlu2 %v1226_v63 }
 0x6fe   : > { %v1228_v0 = vpop.xlane.xlu2 %1227 }
 0x6ff   : > { %v1229_v2 = vmul.f32 %v1228_v0, %v2177_v9 }
 0x701   : > { %v1230_v3 = vsub.f32 %v2268_v62, %v1229_v2 }
 0x703   : > { %v1231_v4 = vmul.f32 %v1230_v3, %v1230_v3 }
 0x705   : > { %v1232_v5 = vsel %vm772_vm1, %v1231_v4, 0.0 }
 0x706   : > { %1233 = vadd.xlane.f32.xlu0 %v1232_v5 }
 0x779   : > { %v1234_v10 = vpop.xlane.xlu0 %1233 }
 0x77a   : > { %v1235_v11 = vmul.f32 %v1234_v10, %v2177_v9 }
 0x77c   : > { %v1236_v12 = vadd.f32 1e-05, %v1235_v11 }
 0x77e   : > { %1817 = vrsqrt.f32 %v1236_v12  ;;  %vm1243_vm12 = vweird.f32 %v1236_v12 }
 0x784   : > { %v1818_v13 = vpop.eup %1817 }
 0x785   : > { %v1238_v14 = vmul.f32 %v1818_v13, %v1236_v12  ;;  %vm1244_vm11 = vweird.f32 %v1818_v13 }
 0x786   : > { %vm1245_vm13 = vmor %vm1243_vm12, %vm1244_vm11 }
 0x787   : > { %v1239_v15 = vmul.f32 %v1818_v13, %v1238_v14 }
 0x789   : > { %v1240_v16 = vmul.f32 0.5, %v1239_v15 }
 0x78b   : > { %v1241_v17 = vsub.f32 1.5, %v1240_v16 }
 0x78d   : > { %v1242_v18 = vmul.f32 %v1818_v13, %v1241_v17 }
 0x78f   : > { %v1246_v20 = vsel %vm1245_vm13, %v1818_v13, %v1242_v18 }
 0x790   : > { %v1247_v21 = vmul.f32 %v1246_v20, %v1230_v3 }
 0x792   : > { %v1251_v23 = vmul.f32 %v1793_v19, %v1247_v21 }
 0x794   : > { %v1255_v24 = vadd.f32 %v1794_v22, %v1251_v23 }
 0x796   : > { %1690 = vmatmul.msk.f32.vlgmr.msrb.gmra.mxu1 %vm772_vm1, %v1255_v24 }
 0x813   : > { %v1284_v40 = vpop.f32.mrf.mxu1 }
 0x814   : > { %v1285_v43 = vadd.f32 %v1795_v38, %v1284_v40 }
 0x816   : > { %v1691_v45 = vmul.f32 -1.702, %v1285_v43 }
 0x818   : > { %v1289_v46 = vmul.f32 1.442695, %v1691_v45 }
 0x81a   : > { %1819 = vpow2.f32 %v1289_v46 }
 0x820   : > { %v1820_v48 = vpop.eup %1819 }
 0x821   : > { %v1291_v49 = vadd.f32 1.0, %v1820_v48 }
 0x823   : > { %1821 = vrcp.f32 %v1291_v49  ;;  %v1303_v53 = vand.u32 2147483648, %v1291_v49  ;;  %v1301_v55 = vand.u32 2147483647, %v1291_v49  ;;  %vm1297_vm15 = vweird.f32 %v1291_v49 }
 0x825   : > { %v1304_v57 = vor.u32 1.1754944e-38, %v1303_v53  ;;  %vm1302_vm2 = vcmp.eq.f32.partialorder %v1301_v55, 8.507059e+37 }
 0x829   : > { %v1822_v50 = vpop.eup %1821 }
 0x82a   : > { %v1293_v52 = vmul.f32 %v1822_v50, %v1291_v49  ;;  %vm1298_vm14 = vweird.f32 %v1822_v50 }
 0x82b   : > { %vm1299_vm0 = vmor %vm1297_vm15, %vm1298_vm14 }
 0x82c   : > { %v1294_v51 = vsub.f32 1.0, %v1293_v52 }
 0x82e   : > { %v1295_v54 = vmul.f32 %v1822_v50, %v1294_v51 }
 0x830   : > { %v1296_v56 = vadd.f32 %v1822_v50, %v1295_v54 }
 0x832   : > { %v1300_v58 = vsel %vm1299_vm0, %v1822_v50, %v1296_v56 }
 0x833   : > { %v1305_v59 = vsel %vm1302_vm2, %v1304_v57, %v1300_v58 }
 0x834   : > { %v1307_v60 = vmul.f32 %v1305_v59, %v1285_v43 }
 0x836   : > { %1340 = vmatmul.f32.vlgmr.msrb.gmra.mxu3 %v1307_v60 }
 0x8b9   : > { %v1341_v63 = vpop.f32.mrf.mxu3 }
 0x8ba   : > { %v1344_v0 = vadd.f32 %v1341_v63, %v2268_v62  ;;  %1354 = sbr.rel (%p1692_p1) target bundleno = 2761 (0xac9), region = 96 }
 0x8bc   : > { %v1349_v2 = vadd.f32 %v1796_v61, %v1344_v0 }
 0x8be   : > { %1350 = vst.msk [vmem:[#allocation2] sm:$0xff] %vm772_vm1, %v1349_v2 }
 0x8bf   : > { %v1357_v3 = vsel %vm772_vm1, %v1349_v2, 0.0  ;;  %vm1387_vm3 = vcmask 57344   ;;  %v1424_v8 = vld [vmem:[%s2474_s27 + $0x18] sm:$0xff]  ;;  %v1423_v10 = vld [vmem:[%s2475_s14 + $0x10] sm:$0xff]  ;;  %v1391_v17 = vcvt.s32.f32 %v2225_v47  ;;  %v1824_v47 = vld [vmem:[%s2477_s21] ss:$0 sm:$0xff] }
 0x8c0   : > { %1358 = vadd.xlane.f32.xlu0 %v1357_v3  ;;  %v1388_v4 = vsel %vm1387_vm3, %v2222_v42, 0.0  ;;  %1440 = vmatpush.msra.mxu1 %v1424_v8  ;;  %v1422_v42 = vld [vmem:[%s2475_s14 + $0x8] sm:$0xff]  ;;  %v1937_v29 = vmov 0.0   ;;  %v1421_v31 = vld [vmem:[%s2475_s14] sm:$0xff]  ;;  %vm1448_vm9 = vcmask 253952  }
 0x8c1   : > { %1389 = vadd.xlane.f32.xlu1 %v1388_v4 }
 0x8c2   : > { %1441 = vmatpush.msra.mxu1 %v1423_v10 }
 0x8c4   : > { %1442 = vmatpush.msra.mxu1 %v1422_v42 }
 0x8c6   : > { %1443 = vmatpush.msra.mxu1 %v1421_v31 }
 0x933   : > { %v1359_v5 = vpop.xlane.xlu0 %1358 }
 0x934   : > { %v1360_v6 = vmul.f32 %v1359_v5, %v2177_v9  ;;  %v1390_v14 = vpop.xlane.xlu1 %1389 }
 0x935   : > { %v1693_v18 = vadd.f32 -1.0, %v1390_v14 }
 0x936   : > { %v1361_v7 = vsub.f32 %v1349_v2, %v1360_v6 }
 0x937   : > { %v1393_v21 = vsub.f32 %v1391_v17, %v1693_v18 }
 0x938   : > { %v1362_v1 = vmul.f32 %v1361_v7, %v1361_v7 }
 0x939   : > { %v1394_v24 = vand.u32 2147483647, %v1393_v21 }
 0x93a   : > { %v1363_v62 = vsel %vm772_vm1, %v1362_v1, 0.0 }
 0x93b   : > { %1364 = vadd.xlane.f32.xlu0 %v1363_v62  ;;  %vm1395_vm8 = vcmp.lt.f32.partialorder %v1394_v24, 0.5 }
 0x93c   : > { %v1694_v30 = vsel %vm1395_vm8, 1.0, %v1937_v29 }
 0x9ae   : > { %v1365_v11 = vpop.xlane.xlu0 %1364 }
 0x9af   : > { %v1366_v12 = vmul.f32 %v1365_v11, %v2177_v9  ;;  %v1823_v9 = vld [vmem:[%s2476_s17] ss:$0 sm:$0xff] }
 0x9b1   : > { %v1367_v13 = vadd.f32 1e-05, %v1366_v12 }
 0x9b3   : > { %1825 = vrsqrt.f32 %v1367_v13  ;;  %vm1374_vm5 = vweird.f32 %v1367_v13 }
 0x9b9   : > { %v1826_v15 = vpop.eup %1825 }
 0x9ba   : > { %v1369_v16 = vmul.f32 %v1826_v15, %v1367_v13  ;;  %vm1375_vm4 = vweird.f32 %v1826_v15 }
 0x9bb   : > { %vm1376_vm7 = vmor %vm1374_vm5, %vm1375_vm4 }
 0x9bc   : > { %v1370_v19 = vmul.f32 %v1826_v15, %v1369_v16 }
 0x9be   : > { %v1371_v20 = vmul.f32 0.5, %v1370_v19 }
 0x9c0   : > { %v1372_v22 = vsub.f32 1.5, %v1371_v20 }
 0x9c2   : > { %v1373_v23 = vmul.f32 %v1826_v15, %v1372_v22 }
 0x9c4   : > { %v1377_v25 = vsel %vm1376_vm7, %v1826_v15, %v1373_v23 }
 0x9c5   : > { %v1378_v26 = vmul.f32 %v1377_v25, %v1361_v7 }
 0x9c7   : > { %v1382_v27 = vmul.f32 %v1823_v9, %v1378_v26 }
 0x9c9   : > { %v1386_v28 = vadd.f32 %v1824_v47, %v1382_v27 }
 0x9cb   : > { %1416 = vmatpush.msra.mxu0 %v1386_v28 }
 0x9cc   : > { %1695 = vmatmul.msk.f32.vlgmr.msra.gmra.mxu0 %vm859_vm6, %v1694_v30 }
 0xa49   : > { %v1418_v32 = vpop.f32.mrf.mxu0 }
 0xa4a   : > { %1696 = vmatmul.msk.f32.vlgmr.msra.gmra.mxu1 %vm772_vm1, %v1418_v32 }
 0xac7   : > { %v1445_v33 = vpop.f32.mrf.mxu1 }
 0xac8   : > { %1449 = vst.msk [vmem:[%s2170_s13] sm:$0x1] %vm1448_vm9, %v1445_v33 }
 0xac9 PF: > { %s2478_s12 = sld [smem:[#allocation9_spill]]  ;;  %s1461_s11 = sshll.u32 %s2170_s13, 4  ;;  %s1462_s11 = int_to_ptr.vmem [resolvable:$true] %s1461_s11 }
 0xaca   : > { %s2479_s6 = sld [smem:[#allocation30_spill]]  ;;  %s2481_s7 = sand.u32 1, %s1897_s25  }
 0xacb   : > { %s1451_s22 = scalar_lea.sflag [#allocation4], %s2481_s7 }
 0xad0   : > { %s1459_s8 = scalar_lea.hbm %s2479_s6, %s2478_s12  ;;  %s1847_s20 = scalar_lea.hbm %s2479_s6, 2 }
 0xad1   : > { %s1463_s29 = sshll.u32 %s1459_s8, 4  ;;  %s1464_s29 = int_to_ptr.hbm [resolvable:$true] %s1463_s29 }
 0xad2   : > { %s1841_s27 = sshra.s32 %s1464_s29, 4  ;;  %s1842_s27 = int_to_ptr.hbm [resolvable:$true] %s1841_s27 }
 0xad3   : > { %s1843_s0 = scalar_lea.hbm %s1842_s27, 1  ;;  %p1848_p6 = scmp.lt.s32.totalorder %s1842_s27, %s2479_s6 }
 0xad4   : > { %p1844_p2 = scmp.ne.s32.totalorder %s1842_s27, %s1843_s0  ;;  %p1849_p7 = scmp.lt.s32.totalorder %s1847_s20, %s1843_s0 }
 0xad6   : > { %p1845_p4 = pnand %p1844_p2, %p2077_p3  ;;  %p1850_p8 = por %p1849_p7, %p1848_p6 }
 0xad8   : > { %p1846_p5 = pneg %p1845_p4 }
 0xada   : > { %p1851_p10 = pnand %p1850_p8, %p1846_p5 }
 0xadc   : > { %1854 = shalt.err (!%p1851_p10)
}
 0xadd   : > { %1703 = dma.vmem_to_hbm [thread:$0]  (%p2077_p3), %s1462_s11, 16, %s1464_s29, %s1451_s22  }
 0xade PF: > { %s2482_s13 = sld [smem:[#allocation12_spill]] }
 0xadf   : > { %s2483_s17 = sld [smem:[#allocation6_spill]] }
 0xae4   : > { %p1709_p11 = scmp.ge.s32.totalorder %s2482_s13, 2 }
 0xae5   : > { %s1475_s19 = sand.u32 1, %s2483_s17  }
 0xae6   : > { %p1706_p12 = pnand %p1709_p11, %p2087_p9  ;;  %s1476_s21 = scalar_lea.sflag [#allocation4], %s1475_s19 }
 0xae8   : > { %p1707_p13 = pneg %p1706_p12 }
 0xaea   : > { %1888 = dma.done.wait (%p1707_p13), %s1476_s21, 16  }
 0xaeb   : > { %1890 = vsyncadd (%p1707_p13), %s1476_s21, 4294967280  ;;  %s30_s30 = sadd.s32 1, %s2482_s13   ;;  %s2485_s15 = sld [smem:[#allocation7_spill]] }
 0xaec   : > { %p27_p0 = scmp.ge.s32.totalorder %s30_s30, 6   ;;  %s2486_s26 = sld [smem:[#allocation17_spill]] }
 0xaed   : > { %s2487_s27 = sld [smem:[#allocation10_spill]]  ;;  %s2491_s24 = smov %s1897_s25 }
 0xaee   : > { %s2488_s28 = sld [smem:[#allocation11_spill]]  ;;  %29 = sbr.rel (!%p27_p0) target bundleno = 19 (0x13), region = 170 }
 0xaef   : > { %s2489_s29 = sld [smem:[#allocation13_spill]] }
 0xaf0   : > { %s2490_s0 = sld [smem:[#allocation15_spill]] }
 0xaf1   : > { %s2492_s25 = smov %s2485_s15 }
 0xaf3   :  { %1481 = vsyncpa [#allocation4], 1 }
 0xaf4   :  { %1483 = vsyncpa [#allocation4 + $0x1], 1 }

</bundles_post_ra>
